<compile_context>
chip_gen: v7x
topology: tpu7x:2x2x1
jax: 0.10.0
libtpu: 0.0.40
codegen_flags: <defaults>
</compile_context>

<pallas_src>
import math
import functools

import jax
import jax.numpy as jnp
from jax.experimental import pallas as pl
from jax.experimental.pallas import tpu as pltpu


# ----------------------------------------------------------------------------
# Pallas kernel: one grid step == one encoder layer (activation carried in VMEM)
# ----------------------------------------------------------------------------
def fused_encoder_kernel(
    x_ref, pos_ref, bias_ref,
    wqk_ref, bqk_ref, wv_ref, bv_ref, wo_ref, bo_ref,
    ln1w_ref, ln1b_ref,
    w1_ref, b1_ref, w2_ref, b2_ref,
    ln2w_ref, ln2b_ref,
    fnw_ref, fnb_ref,
    o_ref,
    x_carry,
    *, nhead, apply_final_norm,
):
    l = pl.program_id(0)
    num_layers = pl.num_programs(0)

    M, D = x_ref.shape          # M = S * B tokens, D = d_model
    Dh = D // nhead
    scale = 1.0 / math.sqrt(Dh)
    f32 = jnp.float32
    bf16 = jnp.bfloat16

    @pl.when(l == 0)
    def _():
        x_carry[...] = x_ref[...].astype(f32)

    x = x_carry[...]                         # (M, D) f32, carried across layers
    pos = pos_ref[...].astype(f32)

    # ---- self attention ------------------------------------------------
    qk_in = (x + pos).astype(bf16)
    # fused Q/K projection: one MXU pass with N = 2*D
    qk = jnp.dot(qk_in, wqk_ref[0], preferred_element_type=f32) + bqk_ref[0]    # (M, 2D)
    v = jnp.dot(x.astype(bf16), wv_ref[0], preferred_element_type=f32) + bv_ref[0]  # (M, D)

    q = qk[:, :D] * scale
    k = qk[:, D:]
    bias = bias_ref[...]                     # (M, M) additive batch block-diag mask

    head_outs = []
    for h in range(nhead):
        sl = slice(h * Dh, (h + 1) * Dh)
        qh = q[:, sl].astype(bf16)
        kh = k[:, sl].astype(bf16)
        vh = v[:, sl].astype(bf16)
        # q @ k^T without an in-kernel transpose (NT dot_general), all batches at once
        s = jax.lax.dot_general(qh, kh, (((1,), (1,)), ((), ())),
                                preferred_element_type=f32) + bias              # (M, M)
        s = s - jnp.max(s, axis=-1, keepdims=True)
        p = jnp.exp(s)
        p = p * pl.reciprocal(jnp.sum(p, axis=-1, keepdims=True), approx=True)
        head_outs.append(jnp.dot(p.astype(bf16), vh, preferred_element_type=f32))
    attn = jnp.concatenate(head_outs, axis=-1)                                   # (M, D)
    attn = jnp.dot(attn.astype(bf16), wo_ref[0], preferred_element_type=f32) + bo_ref[0]

    # ---- residual + LayerNorm 1 (f32) ------------------------------------
    h1 = x + attn
    mu = jnp.mean(h1, axis=-1, keepdims=True)
    var = jnp.mean((h1 - mu) ** 2, axis=-1, keepdims=True)
    h1 = (h1 - mu) * jax.lax.rsqrt(var + 1e-5) * ln1w_ref[0] + ln1b_ref[0]

    # ---- feed forward (ReLU) ---------------------------------------------
    f = jnp.dot(h1.astype(bf16), w1_ref[0], preferred_element_type=f32) + b1_ref[0]
    f = jnp.maximum(f, 0.0)
    f = jnp.dot(f.astype(bf16), w2_ref[0], preferred_element_type=f32) + b2_ref[0]

    # ---- residual + LayerNorm 2 -------------------------------------------
    h2 = h1 + f
    mu = jnp.mean(h2, axis=-1, keepdims=True)
    var = jnp.mean((h2 - mu) ** 2, axis=-1, keepdims=True)
    h2 = (h2 - mu) * jax.lax.rsqrt(var + 1e-5) * ln2w_ref[0] + ln2b_ref[0]

    x_carry[...] = h2

    @pl.when(l == num_layers - 1)
    def _():
        y = h2
        if apply_final_norm:
            m = jnp.mean(y, axis=-1, keepdims=True)
            s2 = jnp.mean((y - m) ** 2, axis=-1, keepdims=True)
            y = (y - m) * jax.lax.rsqrt(s2 + 1e-5) * fnw_ref[...] + fnb_ref[...]
        o_ref[...] = y.astype(o_ref.dtype)


# ----------------------------------------------------------------------------
# Wrapper
# ----------------------------------------------------------------------------
def _shared_spec(a):
    nd = a.ndim
    return pl.BlockSpec(a.shape, lambda l, _nd=nd: (0,) * _nd)


def _per_layer_spec(a):
    nd = a.ndim
    return pl.BlockSpec((1,) + a.shape[1:], lambda l, _nd=nd: (l,) + (0,) * (_nd - 1))


def transformer_encoder(src_sbd, pos_sbd, layer_params, norm_params, nhead):
    """src_sbd, pos_sbd: (S, B, D) as in PyTorch MultiheadAttention. Returns (S, B, D)."""
    S, B, D = src_sbd.shape
    M = S * B
    L = len(layer_params)
    bf16, f32 = jnp.bfloat16, jnp.float32

    def stack(name, dtype):
        return jnp.stack([p[name] for p in layer_params]).astype(dtype)

    # Per-layer weights stacked along a leading L axis; matmul weights in bf16,
    # stored (in, out) so the kernel never transposes.
    wqk = jnp.stack([jnp.concatenate([p["wq"], p["wk"]], axis=1)
                     for p in layer_params]).astype(bf16)            # (L, D, 2D)
    bqk = jnp.stack([jnp.concatenate([p["bq"], p["bk"]], axis=1)
                     for p in layer_params]).astype(f32)             # (L, 1, 2D)
    wv = stack("wv", bf16); bv = stack("bv", f32)
    wo = stack("wo", bf16); bo = stack("bo", f32)
    ln1w = stack("ln1w", f32); ln1b = stack("ln1b", f32)
    w1 = stack("w1", bf16); b1 = stack("b1", f32)
    w2 = stack("w2", bf16); b2 = stack("b2", f32)
    ln2w = stack("ln2w", f32); ln2b = stack("ln2b", f32)

    apply_final_norm = norm_params is not None
    if apply_final_norm:
        fnw, fnb = norm_params
    else:
        fnw, fnb = jnp.ones((1, D), f32), jnp.zeros((1, D), f32)
    fnw = jnp.asarray(fnw, f32).reshape(1, D)
    fnb = jnp.asarray(fnb, f32).reshape(1, D)

    # Tokens flattened row-major: row = s * B + b (free reshape, no transpose).
    x2d = src_sbd.reshape(M, D)
    pos2d = pos_sbd.reshape(M, D)

    # Additive attention bias enforcing per-batch attention in the folded layout.
    bid = jnp.arange(M, dtype=jnp.int32) % B
    attn_bias = jnp.where(bid[:, None] == bid[None, :], 0.0, -1e30).astype(f32)

    weights = [wqk, bqk, wv, bv, wo, bo, ln1w, ln1b, w1, b1, w2, b2, ln2w, ln2b]

    in_specs = ([_shared_spec(x2d), _shared_spec(pos2d), _shared_spec(attn_bias)]
                + [_per_layer_spec(w) for w in weights]
                + [_shared_spec(fnw), _shared_spec(fnb)])

    out2d = pl.pallas_call(
        functools.partial(fused_encoder_kernel, nhead=nhead,
                          apply_final_norm=apply_final_norm),
        out_shape=jax.ShapeDtypeStruct((M, D), src_sbd.dtype),
        grid=(L,),
        in_specs=in_specs,
        out_specs=_shared_spec(x2d),
        scratch_shapes=[pltpu.VMEM((M, D), jnp.float32)],
        compiler_params=pltpu.CompilerParams(dimension_semantics=("arbitrary",)),
    )(x2d, pos2d, attn_bias, *weights, fnw, fnb)

    return out2d.reshape(S, B, D)


# ----------------------------------------------------------------------------
# Deterministic parameter init + pure-JAX reference
# ----------------------------------------------------------------------------
def init_layer_params(key, d_model, dim_ff):
    ks = jax.random.split(key, 8)
    f32 = jnp.float32
    return {
        # Linear weights stored (in_features, out_features): y = x @ w + b
        "wq": jax.random.normal(ks[0], (d_model, d_model), f32) * 0.05,
        "wk": jax.random.normal(ks[1], (d_model, d_model), f32) * 0.05,
        "wv": jax.random.normal(ks[2], (d_model, d_model), f32) * 0.05,
        "bq": jax.random.normal(ks[3], (1, d_model), f32) * 0.01,
        "bk": jax.random.normal(ks[4], (1, d_model), f32) * 0.01,
        "bv": jax.random.normal(ks[5], (1, d_model), f32) * 0.01,
        "wo": jax.random.normal(ks[6], (d_model, d_model), f32) * 0.05,
        "bo": jnp.zeros((1, d_model), f32),
        "ln1w": jnp.ones((1, d_model), f32),
        "ln1b": jnp.zeros((1, d_model), f32),
        "w1": jax.random.normal(ks[7], (d_model, dim_ff), f32) * 0.05,
        "b1": jnp.zeros((1, dim_ff), f32),
        "w2": jax.random.normal(jax.random.fold_in(key, 99), (dim_ff, d_model), f32) * 0.05,
        "b2": jnp.zeros((1, d_model), f32),
        "ln2w": jnp.ones((1, d_model), f32),
        "ln2b": jnp.zeros((1, d_model), f32),
    }


def reference_encoder(src_sbd, pos_sbd, layer_params, norm_params, nhead):
    f32 = jnp.float32

    def ln(x, w, b):
        mu = jnp.mean(x, -1, keepdims=True)
        var = jnp.mean((x - mu) ** 2, -1, keepdims=True)
        return (x - mu) * jax.lax.rsqrt(var + 1e-5) * w + b

    def mm(a, w):  # reference uses the same bf16-rounded weights the kernel sees
        return a @ w.astype(jnp.bfloat16).astype(f32)

    x = jnp.transpose(src_sbd, (1, 0, 2)).astype(f32)   # (B, S, D)
    pos = jnp.transpose(pos_sbd, (1, 0, 2)).astype(f32)
    B, S, D = x.shape
    Dh = D // nhead
    for p in layer_params:
        qk_in = x + pos
        q = mm(qk_in, p["wq"]) + p["bq"]
        k = mm(qk_in, p["wk"]) + p["bk"]
        v = mm(x, p["wv"]) + p["bv"]
        qh = q.reshape(B, S, nhead, Dh).transpose(0, 2, 1, 3) / math.sqrt(Dh)
        kh = k.reshape(B, S, nhead, Dh).transpose(0, 2, 1, 3)
        vh = v.reshape(B, S, nhead, Dh).transpose(0, 2, 1, 3)
        s = jnp.einsum("bhqd,bhkd->bhqk", qh, kh)
        a = jax.nn.softmax(s, axis=-1)
        o = jnp.einsum("bhqk,bhkd->bhqd", a, vh).transpose(0, 2, 1, 3).reshape(B, S, D)
        o = mm(o, p["wo"]) + p["bo"]
        x = ln(x + o, p["ln1w"], p["ln1b"])
        f = mm(jax.nn.relu(mm(x, p["w1"]) + p["b1"]), p["w2"]) + p["b2"]
        x = ln(x + f, p["ln2w"], p["ln2b"])
    if norm_params is not None:
        x = ln(x, norm_params[0], norm_params[1])
    return jnp.transpose(x, (1, 0, 2))


if __name__ == "__main__":
    S, B, D = 8, 2, 32          # seq, batch, d_model
    NHEAD = 4
    DIM_FF = 64
    NUM_LAYERS = 2

    key = jax.random.PRNGKey(0)
    k_src, k_pos, k_par = jax.random.split(key, 3)
    src = jax.random.normal(k_src, (S, B, D), jnp.float32)
    pos = jax.random.normal(k_pos, (S, B, D), jnp.float32) * 0.1

    layer_keys = jax.random.split(k_par, NUM_LAYERS)
    layer_params = [init_layer_params(layer_keys[i], D, DIM_FF) for i in range(NUM_LAYERS)]
    norm_params = (jnp.ones((1, D), jnp.float32), jnp.zeros((1, D), jnp.float32))

    out = transformer_encoder(src, pos, layer_params, norm_params, NHEAD)
    out = jax.block_until_ready(out)

    ref = reference_encoder(src, pos, layer_params, norm_params, NHEAD)
    assert out.shape == (S, B, D)
    assert bool(jnp.all(jnp.isfinite(out)))
    assert jnp.allclose(out, ref, rtol=2e-2, atol=1e-2), (
        "mismatch vs reference, max abs err = %f" % float(jnp.max(jnp.abs(out - ref))))

    print("KERNEL_OK")
</pallas_src>

<mosaic_0001>
module attributes {stable_mosaic.version = 11 : i64} {
  func.func @fused_encoder_kernel(%arg0: i32, %arg1: memref<16x32xf32, #tpu.memory_space<vmem>>, %arg2: memref<16x32xf32, #tpu.memory_space<vmem>>, %arg3: memref<16x16xf32, #tpu.memory_space<vmem>>, %arg4: memref<1x32x64xbf16, #tpu.memory_space<vmem>>, %arg5: memref<1x1x64xf32, #tpu.memory_space<vmem>>, %arg6: memref<1x32x32xbf16, #tpu.memory_space<vmem>>, %arg7: memref<1x1x32xf32, #tpu.memory_space<vmem>>, %arg8: memref<1x32x32xbf16, #tpu.memory_space<vmem>>, %arg9: memref<1x1x32xf32, #tpu.memory_space<vmem>>, %arg10: memref<1x1x32xf32, #tpu.memory_space<vmem>>, %arg11: memref<1x1x32xf32, #tpu.memory_space<vmem>>, %arg12: memref<1x32x64xbf16, #tpu.memory_space<vmem>>, %arg13: memref<1x1x64xf32, #tpu.memory_space<vmem>>, %arg14: memref<1x64x32xbf16, #tpu.memory_space<vmem>>, %arg15: memref<1x1x32xf32, #tpu.memory_space<vmem>>, %arg16: memref<1x1x32xf32, #tpu.memory_space<vmem>>, %arg17: memref<1x1x32xf32, #tpu.memory_space<vmem>>, %arg18: memref<1x32xf32, #tpu.memory_space<vmem>>, %arg19: memref<1x32xf32, #tpu.memory_space<vmem>>, %arg20: memref<16x32xf32, #tpu.memory_space<vmem>>, %arg21: memref<16x32xf32, #tpu.memory_space<vmem>>) attributes {dimension_semantics = [#tpu.dimension_semantics<arbitrary>], iteration_bounds = array<i64: 2>, scalar_prefetch = 0 : i64, scratch_operands = 1 : i64, tpu.core_type = #tpu.core_type<tc>, window_params = [{pipeline_mode = #tpu.pipeline_mode<synchronous>, transform_indices = @transform_0, window_bounds = array<i64: 16, 32>}, {pipeline_mode = #tpu.pipeline_mode<synchronous>, transform_indices = @transform_1, window_bounds = array<i64: 16, 32>}, {pipeline_mode = #tpu.pipeline_mode<synchronous>, transform_indices = @transform_2, window_bounds = array<i64: 16, 16>}, {transform_indices = @transform_3, window_bounds = array<i64: 1, 32, 64>}, {transform_indices = @transform_4, window_bounds = array<i64: 1, 1, 64>}, {transform_indices = @transform_5, window_bounds = array<i64: 1, 32, 32>}, {transform_indices = @transform_6, window_bounds = array<i64: 1, 1, 32>}, {transform_indices = @transform_7, window_bounds = array<i64: 1, 32, 32>}, {transform_indices = @transform_8, window_bounds = array<i64: 1, 1, 32>}, {transform_indices = @transform_9, window_bounds = array<i64: 1, 1, 32>}, {transform_indices = @transform_10, window_bounds = array<i64: 1, 1, 32>}, {transform_indices = @transform_11, window_bounds = array<i64: 1, 32, 64>}, {transform_indices = @transform_12, window_bounds = array<i64: 1, 1, 64>}, {transform_indices = @transform_13, window_bounds = array<i64: 1, 64, 32>}, {transform_indices = @transform_14, window_bounds = array<i64: 1, 1, 32>}, {transform_indices = @transform_15, window_bounds = array<i64: 1, 1, 32>}, {transform_indices = @transform_16, window_bounds = array<i64: 1, 1, 32>}, {pipeline_mode = #tpu.pipeline_mode<synchronous>, transform_indices = @transform_17, window_bounds = array<i64: 1, 32>}, {pipeline_mode = #tpu.pipeline_mode<synchronous>, transform_indices = @transform_18, window_bounds = array<i64: 1, 32>}, {pipeline_mode = #tpu.pipeline_mode<synchronous>, transform_indices = @transform_19, window_bounds = array<i64: 16, 32>}]} {
    %c0_i32 = arith.constant 0 : i32
    %0 = arith.cmpi eq, %arg0, %c0_i32 : i32
    %1 = arith.extui %0 : i1 to i32
    %c0_i32_0 = arith.constant 0 : i32
    %2 = arith.cmpi ne, %1, %c0_i32_0 : i32
    scf.if %2 {
      %c0_83 = arith.constant 0 : index
      %c0_84 = arith.constant 0 : index
      %192 = vector.load %arg1[%c0_83, %c0_84] : memref<16x32xf32, #tpu.memory_space<vmem>>, vector<16x32xf32>
      %c0_85 = arith.constant 0 : index
      %c0_86 = arith.constant 0 : index
      %193 = vector.load %arg21[%c0_85, %c0_86] : memref<16x32xf32, #tpu.memory_space<vmem>>, vector<16x32xf32>
      tpu.vector_store %arg21[%c0_85, %c0_86], %192 {strides = array<i32>} : memref<16x32xf32, #tpu.memory_space<vmem>>, vector<16x32xf32>,
    } else {
    }
    %c0 = arith.constant 0 : index
    %c0_1 = arith.constant 0 : index
    %3 = vector.load %arg21[%c0, %c0_1] : memref<16x32xf32, #tpu.memory_space<vmem>>, vector<16x32xf32>
    %c0_2 = arith.constant 0 : index
    %c0_3 = arith.constant 0 : index
    %4 = vector.load %arg2[%c0_2, %c0_3] : memref<16x32xf32, #tpu.memory_space<vmem>>, vector<16x32xf32>
    %5 = arith.addf %3, %4 : vector<16x32xf32>
    %6 = arith.truncf %5 : vector<16x32xf32> to vector<16x32xbf16>
    %c0_4 = arith.constant 0 : index
    %c0_5 = arith.constant 0 : index
    %c0_6 = arith.constant 0 : index
    %7 = vector.load %arg4[%c0_4, %c0_5, %c0_6] : memref<1x32x64xbf16, #tpu.memory_space<vmem>>, vector<1x32x64xbf16>
    %8 = vector.shape_cast %7 : vector<1x32x64xbf16> to vector<32x64xbf16>
    %cst = arith.constant dense<0.000000e+00> : vector<16x64xf32>
    %9 = tpu.matmul %6, %8, %cst {dimension_numbers = #tpu.dot_dimension_numbers<[1], [0], [0], [1], [0, 0, 1, 1], [], []>} : vector<16x32xbf16>, vector<32x64xbf16>, vector<16x64xf32> -> vector<16x64xf32>
    %c0_7 = arith.constant 0 : index
    %c0_8 = arith.constant 0 : index
    %c0_9 = arith.constant 0 : index
    %10 = vector.load %arg5[%c0_7, %c0_8, %c0_9] : memref<1x1x64xf32, #tpu.memory_space<vmem>>, vector<1x1x64xf32>
    %11 = vector.shape_cast %10 : vector<1x1x64xf32> to vector<1x64xf32>
    %12 = vector.broadcast %11 : vector<1x64xf32> to vector<16x64xf32>
    %13 = arith.addf %9, %12 : vector<16x64xf32>
    %14 = arith.truncf %3 : vector<16x32xf32> to vector<16x32xbf16>
    %c0_10 = arith.constant 0 : index
    %c0_11 = arith.constant 0 : index
    %c0_12 = arith.constant 0 : index
    %15 = vector.load %arg6[%c0_10, %c0_11, %c0_12] : memref<1x32x32xbf16, #tpu.memory_space<vmem>>, vector<1x32x32xbf16>
    %16 = vector.shape_cast %15 : vector<1x32x32xbf16> to vector<32x32xbf16>
    %cst_13 = arith.constant dense<0.000000e+00> : vector<16x32xf32>
    %17 = tpu.matmul %14, %16, %cst_13 {dimension_numbers = #tpu.dot_dimension_numbers<[1], [0], [0], [1], [0, 0, 1, 1], [], []>} : vector<16x32xbf16>, vector<32x32xbf16>, vector<16x32xf32> -> vector<16x32xf32>
    %c0_14 = arith.constant 0 : index
    %c0_15 = arith.constant 0 : index
    %c0_16 = arith.constant 0 : index
    %18 = vector.load %arg7[%c0_14, %c0_15, %c0_16] : memref<1x1x32xf32, #tpu.memory_space<vmem>>, vector<1x1x32xf32>
    %19 = vector.shape_cast %18 : vector<1x1x32xf32> to vector<1x32xf32>
    %20 = vector.broadcast %19 : vector<1x32xf32> to vector<16x32xf32>
    %21 = arith.addf %17, %20 : vector<16x32xf32>
    %22 = vector.extract_strided_slice %13 {offsets = [0, 0], sizes = [16, 32], strides = [1, 1]} : vector<16x64xf32> to vector<16x32xf32>
    %cst_17 = arith.constant 0.353553385 : f32
    %23 = vector.broadcast %cst_17 : f32 to vector<16x32xf32>
    %24 = arith.mulf %22, %23 : vector<16x32xf32>
    %25 = vector.extract_strided_slice %13 {offsets = [0, 32], sizes = [16, 32], strides = [1, 1]} : vector<16x64xf32> to vector<16x32xf32>
    %c0_18 = arith.constant 0 : index
    %c0_19 = arith.constant 0 : index
    %26 = vector.load %arg3[%c0_18, %c0_19] : memref<16x16xf32, #tpu.memory_space<vmem>>, vector<16x16xf32>
    %27 = vector.extract_strided_slice %24 {offsets = [0, 0], sizes = [16, 8], strides = [1, 1]} : vector<16x32xf32> to vector<16x8xf32>
    %28 = arith.truncf %27 : vector<16x8xf32> to vector<16x8xbf16>
    %29 = vector.extract_strided_slice %25 {offsets = [0, 0], sizes = [16, 8], strides = [1, 1]} : vector<16x32xf32> to vector<16x8xf32>
    %30 = arith.truncf %29 : vector<16x8xf32> to vector<16x8xbf16>
    %31 = vector.extract_strided_slice %21 {offsets = [0, 0], sizes = [16, 8], strides = [1, 1]} : vector<16x32xf32> to vector<16x8xf32>
    %32 = arith.truncf %31 : vector<16x8xf32> to vector<16x8xbf16>
    %cst_20 = arith.constant dense<0.000000e+00> : vector<16x16xf32>
    %33 = tpu.matmul %28, %30, %cst_20 {dimension_numbers = #tpu.dot_dimension_numbers<[1], [1], [0], [0], [0, 0, 1, 0], [], []>} : vector<16x8xbf16>, vector<16x8xbf16>, vector<16x16xf32> -> vector<16x16xf32>
    %34 = arith.addf %33, %26 : vector<16x16xf32>
    %cst_21 = arith.constant dense<0xFF800000> : vector<16xf32>
    %35 = vector.multi_reduction <maximumf>, %34, %cst_21 [1] : vector<16x16xf32> to vector<16xf32>
    %36 = vector.shape_cast %35 : vector<16xf32> to vector<16x1xf32>
    %37 = vector.broadcast %36 : vector<16x1xf32> to vector<16x16xf32>
    %38 = arith.subf %34, %37 : vector<16x16xf32>
    %39 = math.exp %38 : vector<16x16xf32>
    %cst_22 = arith.constant dense<0.000000e+00> : vector<16xf32>
    %40 = vector.multi_reduction <add>, %39, %cst_22 [1] : vector<16x16xf32> to vector<16xf32>
    %41 = vector.shape_cast %40 : vector<16xf32> to vector<16x1xf32>
    %42 = tpu.reciprocal %41 {approx = true} : vector<16x1xf32> -> vector<16x1xf32>
    %43 = vector.broadcast %42 : vector<16x1xf32> to vector<16x16xf32>
    %44 = arith.mulf %39, %43 : vector<16x16xf32>
    %45 = arith.truncf %44 : vector<16x16xf32> to vector<16x16xbf16>
    %cst_23 = arith.constant dense<0.000000e+00> : vector<16x8xf32>
    %46 = tpu.matmul %45, %32, %cst_23 {dimension_numbers = #tpu.dot_dimension_numbers<[1], [0], [0], [1], [0, 0, 1, 1], [], []>} : vector<16x16xbf16>, vector<16x8xbf16>, vector<16x8xf32> -> vector<16x8xf32>
    %47 = vector.extract_strided_slice %24 {offsets = [0, 8], sizes = [16, 8], strides = [1, 1]} : vector<16x32xf32> to vector<16x8xf32>
    %48 = arith.truncf %47 : vector<16x8xf32> to vector<16x8xbf16>
    %49 = vector.extract_strided_slice %25 {offsets = [0, 8], sizes = [16, 8], strides = [1, 1]} : vector<16x32xf32> to vector<16x8xf32>
    %50 = arith.truncf %49 : vector<16x8xf32> to vector<16x8xbf16>
    %51 = vector.extract_strided_slice %21 {offsets = [0, 8], sizes = [16, 8], strides = [1, 1]} : vector<16x32xf32> to vector<16x8xf32>
    %52 = arith.truncf %51 : vector<16x8xf32> to vector<16x8xbf16>
    %cst_24 = arith.constant dense<0.000000e+00> : vector<16x16xf32>
    %53 = tpu.matmul %48, %50, %cst_24 {dimension_numbers = #tpu.dot_dimension_numbers<[1], [1], [0], [0], [0, 0, 1, 0], [], []>} : vector<16x8xbf16>, vector<16x8xbf16>, vector<16x16xf32> -> vector<16x16xf32>
    %54 = arith.addf %53, %26 : vector<16x16xf32>
    %cst_25 = arith.constant dense<0xFF800000> : vector<16xf32>
    %55 = vector.multi_reduction <maximumf>, %54, %cst_25 [1] : vector<16x16xf32> to vector<16xf32>
    %56 = vector.shape_cast %55 : vector<16xf32> to vector<16x1xf32>
    %57 = vector.broadcast %56 : vector<16x1xf32> to vector<16x16xf32>
    %58 = arith.subf %54, %57 : vector<16x16xf32>
    %59 = math.exp %58 : vector<16x16xf32>
    %cst_26 = arith.constant dense<0.000000e+00> : vector<16xf32>
    %60 = vector.multi_reduction <add>, %59, %cst_26 [1] : vector<16x16xf32> to vector<16xf32>
    %61 = vector.shape_cast %60 : vector<16xf32> to vector<16x1xf32>
    %62 = tpu.reciprocal %61 {approx = true} : vector<16x1xf32> -> vector<16x1xf32>
    %63 = vector.broadcast %62 : vector<16x1xf32> to vector<16x16xf32>
    %64 = arith.mulf %59, %63 : vector<16x16xf32>
    %65 = arith.truncf %64 : vector<16x16xf32> to vector<16x16xbf16>
    %cst_27 = arith.constant dense<0.000000e+00> : vector<16x8xf32>
    %66 = tpu.matmul %65, %52, %cst_27 {dimension_numbers = #tpu.dot_dimension_numbers<[1], [0], [0], [1], [0, 0, 1, 1], [], []>} : vector<16x16xbf16>, vector<16x8xbf16>, vector<16x8xf32> -> vector<16x8xf32>
    %67 = vector.extract_strided_slice %24 {offsets = [0, 16], sizes = [16, 8], strides = [1, 1]} : vector<16x32xf32> to vector<16x8xf32>
    %68 = arith.truncf %67 : vector<16x8xf32> to vector<16x8xbf16>
    %69 = vector.extract_strided_slice %25 {offsets = [0, 16], sizes = [16, 8], strides = [1, 1]} : vector<16x32xf32> to vector<16x8xf32>
    %70 = arith.truncf %69 : vector<16x8xf32> to vector<16x8xbf16>
    %71 = vector.extract_strided_slice %21 {offsets = [0, 16], sizes = [16, 8], strides = [1, 1]} : vector<16x32xf32> to vector<16x8xf32>
    %72 = arith.truncf %71 : vector<16x8xf32> to vector<16x8xbf16>
    %cst_28 = arith.constant dense<0.000000e+00> : vector<16x16xf32>
    %73 = tpu.matmul %68, %70, %cst_28 {dimension_numbers = #tpu.dot_dimension_numbers<[1], [1], [0], [0], [0, 0, 1, 0], [], []>} : vector<16x8xbf16>, vector<16x8xbf16>, vector<16x16xf32> -> vector<16x16xf32>
    %74 = arith.addf %73, %26 : vector<16x16xf32>
    %cst_29 = arith.constant dense<0xFF800000> : vector<16xf32>
    %75 = vector.multi_reduction <maximumf>, %74, %cst_29 [1] : vector<16x16xf32> to vector<16xf32>
    %76 = vector.shape_cast %75 : vector<16xf32> to vector<16x1xf32>
    %77 = vector.broadcast %76 : vector<16x1xf32> to vector<16x16xf32>
    %78 = arith.subf %74, %77 : vector<16x16xf32>
    %79 = math.exp %78 : vector<16x16xf32>
    %cst_30 = arith.constant dense<0.000000e+00> : vector<16xf32>
    %80 = vector.multi_reduction <add>, %79, %cst_30 [1] : vector<16x16xf32> to vector<16xf32>
    %81 = vector.shape_cast %80 : vector<16xf32> to vector<16x1xf32>
    %82 = tpu.reciprocal %81 {approx = true} : vector<16x1xf32> -> vector<16x1xf32>
    %83 = vector.broadcast %82 : vector<16x1xf32> to vector<16x16xf32>
    %84 = arith.mulf %79, %83 : vector<16x16xf32>
    %85 = arith.truncf %84 : vector<16x16xf32> to vector<16x16xbf16>
    %cst_31 = arith.constant dense<0.000000e+00> : vector<16x8xf32>
    %86 = tpu.matmul %85, %72, %cst_31 {dimension_numbers = #tpu.dot_dimension_numbers<[1], [0], [0], [1], [0, 0, 1, 1], [], []>} : vector<16x16xbf16>, vector<16x8xbf16>, vector<16x8xf32> -> vector<16x8xf32>
    %87 = vector.extract_strided_slice %24 {offsets = [0, 24], sizes = [16, 8], strides = [1, 1]} : vector<16x32xf32> to vector<16x8xf32>
    %88 = arith.truncf %87 : vector<16x8xf32> to vector<16x8xbf16>
    %89 = vector.extract_strided_slice %25 {offsets = [0, 24], sizes = [16, 8], strides = [1, 1]} : vector<16x32xf32> to vector<16x8xf32>
    %90 = arith.truncf %89 : vector<16x8xf32> to vector<16x8xbf16>
    %91 = vector.extract_strided_slice %21 {offsets = [0, 24], sizes = [16, 8], strides = [1, 1]} : vector<16x32xf32> to vector<16x8xf32>
    %92 = arith.truncf %91 : vector<16x8xf32> to vector<16x8xbf16>
    %cst_32 = arith.constant dense<0.000000e+00> : vector<16x16xf32>
    %93 = tpu.matmul %88, %90, %cst_32 {dimension_numbers = #tpu.dot_dimension_numbers<[1], [1], [0], [0], [0, 0, 1, 0], [], []>} : vector<16x8xbf16>, vector<16x8xbf16>, vector<16x16xf32> -> vector<16x16xf32>
    %94 = arith.addf %93, %26 : vector<16x16xf32>
    %cst_33 = arith.constant dense<0xFF800000> : vector<16xf32>
    %95 = vector.multi_reduction <maximumf>, %94, %cst_33 [1] : vector<16x16xf32> to vector<16xf32>
    %96 = vector.shape_cast %95 : vector<16xf32> to vector<16x1xf32>
    %97 = vector.broadcast %96 : vector<16x1xf32> to vector<16x16xf32>
    %98 = arith.subf %94, %97 : vector<16x16xf32>
    %99 = math.exp %98 : vector<16x16xf32>
    %cst_34 = arith.constant dense<0.000000e+00> : vector<16xf32>
    %100 = vector.multi_reduction <add>, %99, %cst_34 [1] : vector<16x16xf32> to vector<16xf32>
    %101 = vector.shape_cast %100 : vector<16xf32> to vector<16x1xf32>
    %102 = tpu.reciprocal %101 {approx = true} : vector<16x1xf32> -> vector<16x1xf32>
    %103 = vector.broadcast %102 : vector<16x1xf32> to vector<16x16xf32>
    %104 = arith.mulf %99, %103 : vector<16x16xf32>
    %105 = arith.truncf %104 : vector<16x16xf32> to vector<16x16xbf16>
    %cst_35 = arith.constant dense<0.000000e+00> : vector<16x8xf32>
    %106 = tpu.matmul %105, %92, %cst_35 {dimension_numbers = #tpu.dot_dimension_numbers<[1], [0], [0], [1], [0, 0, 1, 1], [], []>} : vector<16x16xbf16>, vector<16x8xbf16>, vector<16x8xf32> -> vector<16x8xf32>
    %107 = tpu.concatenate %46, %66, %86, %106 in 1 : vector<16x8xf32>, vector<16x8xf32>, vector<16x8xf32>, vector<16x8xf32> -> vector<16x32xf32>
    %108 = arith.truncf %107 : vector<16x32xf32> to vector<16x32xbf16>
    %c0_36 = arith.constant 0 : index
    %c0_37 = arith.constant 0 : index
    %c0_38 = arith.constant 0 : index
    %109 = vector.load %arg8[%c0_36, %c0_37, %c0_38] : memref<1x32x32xbf16, #tpu.memory_space<vmem>>, vector<1x32x32xbf16>
    %110 = vector.shape_cast %109 : vector<1x32x32xbf16> to vector<32x32xbf16>
    %cst_39 = arith.constant dense<0.000000e+00> : vector<16x32xf32>
    %111 = tpu.matmul %108, %110, %cst_39 {dimension_numbers = #tpu.dot_dimension_numbers<[1], [0], [0], [1], [0, 0, 1, 1], [], []>} : vector<16x32xbf16>, vector<32x32xbf16>, vector<16x32xf32> -> vector<16x32xf32>
    %c0_40 = arith.constant 0 : index
    %c0_41 = arith.constant 0 : index
    %c0_42 = arith.constant 0 : index
    %112 = vector.load %arg9[%c0_40, %c0_41, %c0_42] : memref<1x1x32xf32, #tpu.memory_space<vmem>>, vector<1x1x32xf32>
    %113 = vector.shape_cast %112 : vector<1x1x32xf32> to vector<1x32xf32>
    %114 = vector.broadcast %113 : vector<1x32xf32> to vector<16x32xf32>
    %115 = arith.addf %111, %114 : vector<16x32xf32>
    %116 = arith.addf %3, %115 : vector<16x32xf32>
    %cst_43 = arith.constant dense<0.000000e+00> : vector<16xf32>
    %117 = vector.multi_reduction <add>, %116, %cst_43 [1] : vector<16x32xf32> to vector<16xf32>
    %118 = vector.shape_cast %117 : vector<16xf32> to vector<16x1xf32>
    %cst_44 = arith.constant 3.200000e+01 : f32
    %119 = vector.broadcast %cst_44 : f32 to vector<16x1xf32>
    %120 = arith.divf %118, %119 : vector<16x1xf32>
    %121 = vector.broadcast %120 : vector<16x1xf32> to vector<16x32xf32>
    %122 = arith.subf %116, %121 : vector<16x32xf32>
    %123 = arith.mulf %122, %122 : vector<16x32xf32>
    %cst_45 = arith.constant dense<0.000000e+00> : vector<16xf32>
    %124 = vector.multi_reduction <add>, %123, %cst_45 [1] : vector<16x32xf32> to vector<16xf32>
    %125 = vector.shape_cast %124 : vector<16xf32> to vector<16x1xf32>
    %cst_46 = arith.constant 3.200000e+01 : f32
    %126 = vector.broadcast %cst_46 : f32 to vector<16x1xf32>
    %127 = arith.divf %125, %126 : vector<16x1xf32>
    %128 = vector.broadcast %120 : vector<16x1xf32> to vector<16x32xf32>
    %129 = arith.subf %116, %128 : vector<16x32xf32>
    %cst_47 = arith.constant 9.99999974E-6 : f32
    %130 = vector.broadcast %cst_47 : f32 to vector<16x1xf32>
    %131 = arith.addf %127, %130 : vector<16x1xf32>
    %132 = math.rsqrt %131 : vector<16x1xf32>
    %133 = vector.broadcast %132 : vector<16x1xf32> to vector<16x32xf32>
    %134 = arith.mulf %129, %133 : vector<16x32xf32>
    %c0_48 = arith.constant 0 : index
    %c0_49 = arith.constant 0 : index
    %c0_50 = arith.constant 0 : index
    %135 = vector.load %arg10[%c0_48, %c0_49, %c0_50] : memref<1x1x32xf32, #tpu.memory_space<vmem>>, vector<1x1x32xf32>
    %136 = vector.shape_cast %135 : vector<1x1x32xf32> to vector<1x32xf32>
    %137 = vector.broadcast %136 : vector<1x32xf32> to vector<16x32xf32>
    %138 = arith.mulf %134, %137 : vector<16x32xf32>
    %c0_51 = arith.constant 0 : index
    %c0_52 = arith.constant 0 : index
    %c0_53 = arith.constant 0 : index
    %139 = vector.load %arg11[%c0_51, %c0_52, %c0_53] : memref<1x1x32xf32, #tpu.memory_space<vmem>>, vector<1x1x32xf32>
    %140 = vector.shape_cast %139 : vector<1x1x32xf32> to vector<1x32xf32>
    %141 = vector.broadcast %140 : vector<1x32xf32> to vector<16x32xf32>
    %142 = arith.addf %138, %141 : vector<16x32xf32>
    %143 = arith.truncf %142 : vector<16x32xf32> to vector<16x32xbf16>
    %c0_54 = arith.constant 0 : index
    %c0_55 = arith.constant 0 : index
    %c0_56 = arith.constant 0 : index
    %144 = vector.load %arg12[%c0_54, %c0_55, %c0_56] : memref<1x32x64xbf16, #tpu.memory_space<vmem>>, vector<1x32x64xbf16>
    %145 = vector.shape_cast %144 : vector<1x32x64xbf16> to vector<32x64xbf16>
    %cst_57 = arith.constant dense<0.000000e+00> : vector<16x64xf32>
    %146 = tpu.matmul %143, %145, %cst_57 {dimension_numbers = #tpu.dot_dimension_numbers<[1], [0], [0], [1], [0, 0, 1, 1], [], []>} : vector<16x32xbf16>, vector<32x64xbf16>, vector<16x64xf32> -> vector<16x64xf32>
    %c0_58 = arith.constant 0 : index
    %c0_59 = arith.constant 0 : index
    %c0_60 = arith.constant 0 : index
    %147 = vector.load %arg13[%c0_58, %c0_59, %c0_60] : memref<1x1x64xf32, #tpu.memory_space<vmem>>, vector<1x1x64xf32>
    %148 = vector.shape_cast %147 : vector<1x1x64xf32> to vector<1x64xf32>
    %149 = vector.broadcast %148 : vector<1x64xf32> to vector<16x64xf32>
    %150 = arith.addf %146, %149 : vector<16x64xf32>
    %cst_61 = arith.constant 0.000000e+00 : f32
    %151 = vector.broadcast %cst_61 : f32 to vector<16x64xf32>
    %152 = arith.maximumf %150, %151 : vector<16x64xf32>
    %153 = arith.truncf %152 : vector<16x64xf32> to vector<16x64xbf16>
    %c0_62 = arith.constant 0 : index
    %c0_63 = arith.constant 0 : index
    %c0_64 = arith.constant 0 : index
    %154 = vector.load %arg14[%c0_62, %c0_63, %c0_64] : memref<1x64x32xbf16, #tpu.memory_space<vmem>>, vector<1x64x32xbf16>
    %155 = vector.shape_cast %154 : vector<1x64x32xbf16> to vector<64x32xbf16>
    %cst_65 = arith.constant dense<0.000000e+00> : vector<16x32xf32>
    %156 = tpu.matmul %153, %155, %cst_65 {dimension_numbers = #tpu.dot_dimension_numbers<[1], [0], [0], [1], [0, 0, 1, 1], [], []>} : vector<16x64xbf16>, vector<64x32xbf16>, vector<16x32xf32> -> vector<16x32xf32>
    %c0_66 = arith.constant 0 : index
    %c0_67 = arith.constant 0 : index
    %c0_68 = arith.constant 0 : index
    %157 = vector.load %arg15[%c0_66, %c0_67, %c0_68] : memref<1x1x32xf32, #tpu.memory_space<vmem>>, vector<1x1x32xf32>
    %158 = vector.shape_cast %157 : vector<1x1x32xf32> to vector<1x32xf32>
    %159 = vector.broadcast %158 : vector<1x32xf32> to vector<16x32xf32>
    %160 = arith.addf %156, %159 : vector<16x32xf32>
    %161 = arith.addf %142, %160 : vector<16x32xf32>
    %cst_69 = arith.constant dense<0.000000e+00> : vector<16xf32>
    %162 = vector.multi_reduction <add>, %161, %cst_69 [1] : vector<16x32xf32> to vector<16xf32>
    %163 = vector.shape_cast %162 : vector<16xf32> to vector<16x1xf32>
    %cst_70 = arith.constant 3.200000e+01 : f32
    %164 = vector.broadcast %cst_70 : f32 to vector<16x1xf32>
    %165 = arith.divf %163, %164 : vector<16x1xf32>
    %166 = vector.broadcast %165 : vector<16x1xf32> to vector<16x32xf32>
    %167 = arith.subf %161, %166 : vector<16x32xf32>
    %168 = arith.mulf %167, %167 : vector<16x32xf32>
    %cst_71 = arith.constant dense<0.000000e+00> : vector<16xf32>
    %169 = vector.multi_reduction <add>, %168, %cst_71 [1] : vector<16x32xf32> to vector<16xf32>
    %170 = vector.shape_cast %169 : vector<16xf32> to vector<16x1xf32>
    %cst_72 = arith.constant 3.200000e+01 : f32
    %171 = vector.broadcast %cst_72 : f32 to vector<16x1xf32>
    %172 = arith.divf %170, %171 : vector<16x1xf32>
    %173 = vector.broadcast %165 : vector<16x1xf32> to vector<16x32xf32>
    %174 = arith.subf %161, %173 : vector<16x32xf32>
    %cst_73 = arith.constant 9.99999974E-6 : f32
    %175 = vector.broadcast %cst_73 : f32 to vector<16x1xf32>
    %176 = arith.addf %172, %175 : vector<16x1xf32>
    %177 = math.rsqrt %176 : vector<16x1xf32>
    %178 = vector.broadcast %177 : vector<16x1xf32> to vector<16x32xf32>
    %179 = arith.mulf %174, %178 : vector<16x32xf32>
    %c0_74 = arith.constant 0 : index
    %c0_75 = arith.constant 0 : index
    %c0_76 = arith.constant 0 : index
    %180 = vector.load %arg16[%c0_74, %c0_75, %c0_76] : memref<1x1x32xf32, #tpu.memory_space<vmem>>, vector<1x1x32xf32>
    %181 = vector.shape_cast %180 : vector<1x1x32xf32> to vector<1x32xf32>
    %182 = vector.broadcast %181 : vector<1x32xf32> to vector<16x32xf32>
    %183 = arith.mulf %179, %182 : vector<16x32xf32>
    %c0_77 = arith.constant 0 : index
    %c0_78 = arith.constant 0 : index
    %c0_79 = arith.constant 0 : index
    %184 = vector.load %arg17[%c0_77, %c0_78, %c0_79] : memref<1x1x32xf32, #tpu.memory_space<vmem>>, vector<1x1x32xf32>
    %185 = vector.shape_cast %184 : vector<1x1x32xf32> to vector<1x32xf32>
    %186 = vector.broadcast %185 : vector<1x32xf32> to vector<16x32xf32>
    %187 = arith.addf %183, %186 : vector<16x32xf32>
    %c0_80 = arith.constant 0 : index
    %c0_81 = arith.constant 0 : index
    %188 = vector.load %arg21[%c0_80, %c0_81] : memref<16x32xf32, #tpu.memory_space<vmem>>, vector<16x32xf32>
    tpu.vector_store %arg21[%c0_80, %c0_81], %187 {strides = array<i32>} : memref<16x32xf32, #tpu.memory_space<vmem>>, vector<16x32xf32>,
    %c1_i32 = arith.constant 1 : i32
    %189 = arith.cmpi eq, %arg0, %c1_i32 : i32
    %190 = arith.extui %189 : i1 to i32
    %c0_i32_82 = arith.constant 0 : i32
    %191 = arith.cmpi ne, %190, %c0_i32_82 : i32
    scf.if %191 {
      %cst_83 = arith.constant dense<0.000000e+00> : vector<16xf32>
      %192 = vector.multi_reduction <add>, %187, %cst_83 [1] : vector<16x32xf32> to vector<16xf32>
      %193 = vector.shape_cast %192 : vector<16xf32> to vector<16x1xf32>
      %cst_84 = arith.constant 3.200000e+01 : f32
      %194 = vector.broadcast %cst_84 : f32 to vector<16x1xf32>
      %195 = arith.divf %193, %194 : vector<16x1xf32>
      %196 = vector.broadcast %195 : vector<16x1xf32> to vector<16x32xf32>
      %197 = arith.subf %187, %196 : vector<16x32xf32>
      %198 = arith.mulf %197, %197 : vector<16x32xf32>
      %cst_85 = arith.constant dense<0.000000e+00> : vector<16xf32>
      %199 = vector.multi_reduction <add>, %198, %cst_85 [1] : vector<16x32xf32> to vector<16xf32>
      %200 = vector.shape_cast %199 : vector<16xf32> to vector<16x1xf32>
      %cst_86 = arith.constant 3.200000e+01 : f32
      %201 = vector.broadcast %cst_86 : f32 to vector<16x1xf32>
      %202 = arith.divf %200, %201 : vector<16x1xf32>
      %203 = vector.broadcast %195 : vector<16x1xf32> to vector<16x32xf32>
      %204 = arith.subf %187, %203 : vector<16x32xf32>
      %cst_87 = arith.constant 9.99999974E-6 : f32
      %205 = vector.broadcast %cst_87 : f32 to vector<16x1xf32>
      %206 = arith.addf %202, %205 : vector<16x1xf32>
      %207 = math.rsqrt %206 : vector<16x1xf32>
      %208 = vector.broadcast %207 : vector<16x1xf32> to vector<16x32xf32>
      %209 = arith.mulf %204, %208 : vector<16x32xf32>
      %c0_88 = arith.constant 0 : index
      %c0_89 = arith.constant 0 : index
      %210 = vector.load %arg18[%c0_88, %c0_89] : memref<1x32xf32, #tpu.memory_space<vmem>>, vector<1x32xf32>
      %211 = vector.broadcast %210 : vector<1x32xf32> to vector<16x32xf32>
      %212 = arith.mulf %209, %211 : vector<16x32xf32>
      %c0_90 = arith.constant 0 : index
      %c0_91 = arith.constant 0 : index
      %213 = vector.load %arg19[%c0_90, %c0_91] : memref<1x32xf32, #tpu.memory_space<vmem>>, vector<1x32xf32>
      %214 = vector.broadcast %213 : vector<1x32xf32> to vector<16x32xf32>
      %215 = arith.addf %212, %214 : vector<16x32xf32>
      %c0_92 = arith.constant 0 : index
      %c0_93 = arith.constant 0 : index
      %216 = vector.load %arg20[%c0_92, %c0_93] : memref<16x32xf32, #tpu.memory_space<vmem>>, vector<16x32xf32>
      tpu.vector_store %arg20[%c0_92, %c0_93], %215 {strides = array<i32>} : memref<16x32xf32, #tpu.memory_space<vmem>>, vector<16x32xf32>,
    } else {
    }
    return
  }
  func.func @transform_0(%arg0: i32) -> (i32, i32) {
    %c0_i32 = arith.constant 0 : i32
    %c0_i32_0 = arith.constant 0 : i32
    %c0_i32_1 = arith.constant 0 : i32
    return %c0_i32, %c0_i32_0 : i32, i32
  }
  func.func @transform_1(%arg0: i32) -> (i32, i32) {
    %c0_i32 = arith.constant 0 : i32
    %c0_i32_0 = arith.constant 0 : i32
    %c0_i32_1 = arith.constant 0 : i32
    return %c0_i32, %c0_i32_0 : i32, i32
  }
  func.func @transform_2(%arg0: i32) -> (i32, i32) {
    %c0_i32 = arith.constant 0 : i32
    %c0_i32_0 = arith.constant 0 : i32
    %c0_i32_1 = arith.constant 0 : i32
    return %c0_i32, %c0_i32_0 : i32, i32
  }
  func.func @transform_3(%arg0: i32) -> (i32, i32, i32) {
    %c0_i32 = arith.constant 0 : i32
    %c0_i32_0 = arith.constant 0 : i32
    %c0_i32_1 = arith.constant 0 : i32
    return %arg0, %c0_i32, %c0_i32_0 : i32, i32, i32
  }
  func.func @transform_4(%arg0: i32) -> (i32, i32, i32) {
    %c0_i32 = arith.constant 0 : i32
    %c0_i32_0 = arith.constant 0 : i32
    %c0_i32_1 = arith.constant 0 : i32
    return %arg0, %c0_i32, %c0_i32_0 : i32, i32, i32
  }
  func.func @transform_5(%arg0: i32) -> (i32, i32, i32) {
    %c0_i32 = arith.constant 0 : i32
    %c0_i32_0 = arith.constant 0 : i32
    %c0_i32_1 = arith.constant 0 : i32
    return %arg0, %c0_i32, %c0_i32_0 : i32, i32, i32
  }
  func.func @transform_6(%arg0: i32) -> (i32, i32, i32) {
    %c0_i32 = arith.constant 0 : i32
    %c0_i32_0 = arith.constant 0 : i32
    %c0_i32_1 = arith.constant 0 : i32
    return %arg0, %c0_i32, %c0_i32_0 : i32, i32, i32
  }
  func.func @transform_7(%arg0: i32) -> (i32, i32, i32) {
    %c0_i32 = arith.constant 0 : i32
    %c0_i32_0 = arith.constant 0 : i32
    %c0_i32_1 = arith.constant 0 : i32
    return %arg0, %c0_i32, %c0_i32_0 : i32, i32, i32
  }
  func.func @transform_8(%arg0: i32) -> (i32, i32, i32) {
    %c0_i32 = arith.constant 0 : i32
    %c0_i32_0 = arith.constant 0 : i32
    %c0_i32_1 = arith.constant 0 : i32
    return %arg0, %c0_i32, %c0_i32_0 : i32, i32, i32
  }
  func.func @transform_9(%arg0: i32) -> (i32, i32, i32) {
    %c0_i32 = arith.constant 0 : i32
    %c0_i32_0 = arith.constant 0 : i32
    %c0_i32_1 = arith.constant 0 : i32
    return %arg0, %c0_i32, %c0_i32_0 : i32, i32, i32
  }
  func.func @transform_10(%arg0: i32) -> (i32, i32, i32) {
    %c0_i32 = arith.constant 0 : i32
    %c0_i32_0 = arith.constant 0 : i32
    %c0_i32_1 = arith.constant 0 : i32
    return %arg0, %c0_i32, %c0_i32_0 : i32, i32, i32
  }
  func.func @transform_11(%arg0: i32) -> (i32, i32, i32) {
    %c0_i32 = arith.constant 0 : i32
    %c0_i32_0 = arith.constant 0 : i32
    %c0_i32_1 = arith.constant 0 : i32
    return %arg0, %c0_i32, %c0_i32_0 : i32, i32, i32
  }
  func.func @transform_12(%arg0: i32) -> (i32, i32, i32) {
    %c0_i32 = arith.constant 0 : i32
    %c0_i32_0 = arith.constant 0 : i32
    %c0_i32_1 = arith.constant 0 : i32
    return %arg0, %c0_i32, %c0_i32_0 : i32, i32, i32
  }
  func.func @transform_13(%arg0: i32) -> (i32, i32, i32) {
    %c0_i32 = arith.constant 0 : i32
    %c0_i32_0 = arith.constant 0 : i32
    %c0_i32_1 = arith.constant 0 : i32
    return %arg0, %c0_i32, %c0_i32_0 : i32, i32, i32
  }
  func.func @transform_14(%arg0: i32) -> (i32, i32, i32) {
    %c0_i32 = arith.constant 0 : i32
    %c0_i32_0 = arith.constant 0 : i32
    %c0_i32_1 = arith.constant 0 : i32
    return %arg0, %c0_i32, %c0_i32_0 : i32, i32, i32
  }
  func.func @transform_15(%arg0: i32) -> (i32, i32, i32) {
    %c0_i32 = arith.constant 0 : i32
    %c0_i32_0 = arith.constant 0 : i32
    %c0_i32_1 = arith.constant 0 : i32
    return %arg0, %c0_i32, %c0_i32_0 : i32, i32, i32
  }
  func.func @transform_16(%arg0: i32) -> (i32, i32, i32) {
    %c0_i32 = arith.constant 0 : i32
    %c0_i32_0 = arith.constant 0 : i32
    %c0_i32_1 = arith.constant 0 : i32
    return %arg0, %c0_i32, %c0_i32_0 : i32, i32, i32
  }
  func.func @transform_17(%arg0: i32) -> (i32, i32) {
    %c0_i32 = arith.constant 0 : i32
    %c0_i32_0 = arith.constant 0 : i32
    %c0_i32_1 = arith.constant 0 : i32
    return %c0_i32, %c0_i32_0 : i32, i32
  }
  func.func @transform_18(%arg0: i32) -> (i32, i32) {
    %c0_i32 = arith.constant 0 : i32
    %c0_i32_0 = arith.constant 0 : i32
    %c0_i32_1 = arith.constant 0 : i32
    return %c0_i32, %c0_i32_0 : i32, i32
  }
  func.func @transform_19(%arg0: i32) -> (i32, i32) {
    %c0_i32 = arith.constant 0 : i32
    %c0_i32_0 = arith.constant 0 : i32
    %c0_i32_1 = arith.constant 0 : i32
    return %c0_i32, %c0_i32_0 : i32, i32
  }
}

</mosaic_0001>

<bundles_post_ra>
// kernel: tpu_custom_call.1
= control target key start
LH: loop header
LB: loop body
LE: loop exit
PB: predicated region body
PF: predicated region fallthrough
CT: control target
= control target key end

     0   :  { %s3274_s0 = inlined_call_operand.hbm [shape: f32[16,32], index: 0, kind: input, shape index: {}]   ;;  %s3275_s1 = inlined_call_operand.hbm [shape: f32[16,32], index: 1, kind: input, shape index: {}]   ;;  %s3276_s2 = inlined_call_operand.hbm [shape: f32[16,16], index: 2, kind: input, shape index: {}]   ;;  %s3277_s3 = inlined_call_operand.vmem [shape: bf16[2,32,64], index: 3, kind: input, shape index: {}]   ;;  %s3278_s4 = inlined_call_operand.vmem [shape: f32[2,1,64], index: 4, kind: input, shape index: {}]   ;;  %s3279_s5 = inlined_call_operand.vmem [shape: bf16[2,32,32], index: 5, kind: input, shape index: {}]   ;;  %s3280_s6 = inlined_call_operand.vmem [shape: f32[2,1,32], index: 6, kind: input, shape index: {}]   ;;  %s3281_s7 = inlined_call_operand.vmem [shape: bf16[2,32,32], index: 7, kind: input, shape index: {}]   ;;  %s3282_s8 = inlined_call_operand.vmem [shape: f32[2,1,32], index: 8, kind: input, shape index: {}]   ;;  %s3283_s9 = inlined_call_operand.vmem [shape: f32[2,1,32], index: 9, kind: input, shape index: {}]   ;;  %s3284_s10 = inlined_call_operand.vmem [shape: f32[2,1,32], index: 10, kind: input, shape index: {}]   ;;  %s3285_s11 = inlined_call_operand.hbm [shape: bf16[2,32,64], index: 11, kind: input, shape index: {}]   ;;  %s3286_s12 = inlined_call_operand.vmem [shape: f32[2,1,64], index: 12, kind: input, shape index: {}]   ;;  %s3287_s13 = inlined_call_operand.vmem [shape: bf16[2,64,32], index: 13, kind: input, shape index: {}]   ;;  %s3288_s14 = inlined_call_operand.vmem [shape: f32[2,1,32], index: 14, kind: input, shape index: {}]   ;;  %s3289_s15 = inlined_call_operand.vmem [shape: f32[2,1,32], index: 15, kind: input, shape index: {}]   ;;  %s3290_s16 = inlined_call_operand.vmem [shape: f32[2,1,32], index: 16, kind: input, shape index: {}]   ;;  %s3291_s17 = inlined_call_operand.vmem [shape: f32[1,32], index: 17, kind: input, shape index: {}]   ;;  %s3292_s18 = inlined_call_operand.vmem [shape: f32[1,32], index: 18, kind: input, shape index: {}]   ;;  %s3293_s19 = inlined_call_operand.hbm [shape: f32[16,32], index: 19, kind: output, shape index: {}]  }
   0x1   :  { %3308 = sst [smem:[#allocation20_spill]] %s3274_s0 }
   0x2   :  { %3309 = sst [smem:[#allocation21_spill]] %s3275_s1 }
   0x3   :  { %3310 = sst [smem:[#allocation22_spill]] %s3276_s2 }
   0x4   :  { %3311 = sst [smem:[#allocation23_spill]] %s3277_s3 }
   0x5   :  { %3312 = sst [smem:[#allocation24_spill]] %s3279_s5 }
   0x6   :  { %3313 = sst [smem:[#allocation25_spill]] %s3281_s7 }
   0x7   :  { %3314 = sst [smem:[#allocation26_spill]] %s3284_s10 }
   0x8   :  { %3315 = sst [smem:[#allocation27_spill]] %s3285_s11 }
   0x9   :  { %3316 = sst [smem:[#allocation28_spill]] %s3286_s12 }
   0xa   :  { %3317 = sst [smem:[#allocation29_spill]] %s3287_s13 }
   0xb   :  { %3318 = sst [smem:[#allocation30_spill]] %s3288_s14 }
   0xc   :  { %3319 = sst [smem:[#allocation31_spill]] %s3289_s15 }
   0xd   :  { %3320 = sst [smem:[#allocation32_spill]] %s3290_s16 }
   0xe   :  { %3321 = sst [smem:[#allocation33_spill]] %s3291_s17 }
   0xf   :  { %3322 = sst [smem:[#allocation34_spill]] %s3292_s18 }
  0x10   :  { %3323 = sst [smem:[#allocation35_spill]] %s3293_s19 }
  0x11   :  { %24 = vsyncpa [#allocation4], 0 }
  0x12   :  { %25 = vsyncpa [#allocation7], 0 }
  0x13   :  { %26 = vsyncpa [#allocation10], 0 }
  0x14   :  { %28 = vsyncpa [#allocation10 + $0x1], 0 }
  0x15   :  { %29 = vsyncpa [#allocation5], 0  ;;  %s2790_s0 = smov 0   ;;  %s2792_s30 = smov 0  }
  0x16   :  { %s2794_s20 = smov 0   ;;  %s2796_s21 = smov 0  }
  0x17 LB: > { %3324 = sst [smem:[#allocation16_spill]] %s2658_s30  ;;  %s2809_s1 = sadd.s32 4294967295, %s2666_s21   ;;  %s2666_s21 = sphi %s2796_s21, %s3369_s21   ;;  %s2662_s20 = sphi %s2794_s20, %s3372_s20   ;;  %s2658_s30 = sphi %s2792_s30, %s3371_s30   ;;  %s2654_s0 = sphi %s2790_s0, %s3370_s0  }
  0x18   : > { %3325 = sst [smem:[#allocation17_spill]] %s2662_s20  ;;  %p326_p0 = scmp.ne.s32.totalorder %s2658_s30, %s2654_s0 }
  0x19   : > { %p3298_p1 = scmp.eq.s32.totalorder %s2809_s1, 0  ;;  %p2122_p2 = scmp.ge.s32.totalorder %s2666_s21, 1 }
  0x1a   : > { %p530_p3 = scmp.lt.s32.totalorder %s2666_s21, 3  ;;  %s2668_s23 = smov [#allocation6]  }
  0x1b   : > { %p2818_p5 = por %p3298_p1, %p326_p0  ;;  %s555_s24 = sshll.u32 %s2668_s23, 4  ;;  %s2828_s24 = int_to_ptr.vmem [resolvable:$true] %s555_s24 }
  0x1c   : > { %p2822_p6 = pnand %p2122_p2, %p530_p3  ;;  %s2669_s3 = smov [#allocation3]  }
  0x1d   : > { %s3326_s22 = scalar_select %p2818_p5, 1, 0 }
  0x1e   : > { %s3327_s2 = scalar_select %p2822_p6, 1, 0 }
  0x1f   : > { %p2333_p7 = pneg %p2822_p6  ;;  %s542_s26 = sshll.u32 %s2669_s3, 4  ;;  %s2836_s26 = int_to_ptr.vmem [resolvable:$true] %s542_s26 }
  0x20   : > { %s2670_s27 = smov [#allocation8]   ;;  %s3329_s19 = sld [smem:[#allocation21_spill]] }
  0x21   : > { %p2832_p8 = pnand %p2333_p7, %p3298_p1  ;;  %s2838_s28 = sshll.u32 %s2670_s27, 4  ;;  %s569_s28 = int_to_ptr.vmem [resolvable:$true] %s2838_s28 }
  0x23   : > { %p2848_p10 = pneg %p2832_p8 }
  0x26   : > { %s2480_s18 = scalar_lea.hbm %s3329_s19, 256 }
  0x27   : > { %p2481_p9 = scmp.ne.s32.totalorder %s3329_s19, %s2480_s18  ;;  %p2487_p13 = scmp.lt.u32.totalorder %s2480_s18, %s3329_s19 }
  0x29   : > { %p2483_p11 = pnand %p2848_p10, %p2481_p9 }
  0x2b   : > { %p2484_p12 = pneg %p2483_p11 }
  0x2d   : > { %p2489_p0 = pnand %p2487_p13, %p2484_p12 }
  0x2f   : > { %2492 = shalt.err (!%p2489_p0)
}
  0x30   : > { %s2493_s17 = scalar_lea.vmem %s2828_s24, 256  ;;  %p2501_p4 = scmp.lt.s32.totalorder %s2828_s24, %s2828_s24 }
  0x31   : > { %p2494_p2 = scmp.ne.s32.totalorder %s2828_s24, %s2493_s17  ;;  %p2502_p1 = scmp.lt.s32.totalorder %s2493_s17, %s2493_s17 }
  0x33   : > { %p2496_p3 = pnand %p2494_p2, %p2848_p10  ;;  %p2503_p9 = por %p2502_p1, %p2501_p4 }
  0x35   : > { %p2497_p7 = pneg %p2496_p3 }
  0x37   : > { %p2504_p11 = pnand %p2503_p9, %p2497_p7 }
  0x39   : > { %2507 = shalt.err (!%p2504_p11)
}
  0x3a   : > { %s2671_s29 = smov 128   ;;  %s2672_s18 = smov 8  }
  0x3b   : > { %2339 = dma.hbm_to_vmem [thread:$0]  (!%p2832_p8), %s3329_s19, 256, %s2828_s24, [#allocation7], %s2671_s29, %s2671_s29, %s2672_s18  }
  0x3c   : > { %s3331_s15 = sld [smem:[#allocation20_spill]] }
  0x42   : > { %s2508_s17 = scalar_lea.hbm %s3331_s15, 256 }
  0x43   : > { %p2509_p1 = scmp.ne.s32.totalorder %s3331_s15, %s2508_s17  ;;  %p2515_p13 = scmp.lt.u32.totalorder %s2508_s17, %s3331_s15 }
  0x45   : > { %p2511_p4 = pnand %p2509_p1, %p2848_p10 }
  0x47   : > { %p2512_p12 = pneg %p2511_p4 }
  0x49   : > { %p2517_p0 = pnand %p2515_p13, %p2512_p12 }
  0x4b   : > { %2520 = shalt.err (!%p2517_p0)
}
  0x4c   : > { %s2521_s24 = scalar_lea.vmem %s2836_s26, 256  ;;  %p2529_p9 = scmp.lt.s32.totalorder %s2836_s26, %s2836_s26 }
  0x4d   : > { %p2522_p2 = scmp.ne.s32.totalorder %s2836_s26, %s2521_s24  ;;  %p2530_p11 = scmp.lt.s32.totalorder %s2521_s24, %s2521_s24 }
  0x4f   : > { %p2524_p3 = pnand %p2522_p2, %p2848_p10  ;;  %p2531_p1 = por %p2530_p11, %p2529_p9 }
  0x51   : > { %p2525_p7 = pneg %p2524_p3 }
  0x53   : > { %p2532_p4 = pnand %p2531_p1, %p2525_p7 }
  0x55   : > { %2535 = shalt.err (!%p2532_p4)
}
  0x56   : > { %2336 = dma.hbm_to_vmem [thread:$0]  (!%p2832_p8), %s3331_s15, 256, %s2836_s26, [#allocation4], %s2671_s29, %s2671_s29, %s2672_s18  }
  0x57   : > { %s3332_s0 = sld [smem:[#allocation22_spill]] }
  0x5d   : > { %s3333_s23 = smov %s3332_s0  ;;  %s2536_s3 = scalar_lea.hbm %s3332_s0, 256 }
  0x5e   : > { %p2537_p12 = scmp.ne.s32.totalorder %s3333_s23, %s2536_s3  ;;  %p2543_p2 = scmp.lt.u32.totalorder %s2536_s3, %s3333_s23 }
  0x60   : > { %p2539_p13 = pnand %p2537_p12, %p2848_p10 }
  0x62   : > { %p2540_p0 = pneg %p2539_p13 }
  0x64   : > { %p2545_p3 = pnand %p2543_p2, %p2540_p0 }
  0x66   : > { %2548 = shalt.err (!%p2545_p3)
}
  0x67   : > { %s2549_s10 = scalar_lea.vmem %s569_s28, 256  ;;  %p2557_p1 = scmp.lt.s32.totalorder %s569_s28, %s569_s28 }
  0x68   : > { %p2550_p7 = scmp.ne.s32.totalorder %s569_s28, %s2549_s10  ;;  %p2558_p4 = scmp.lt.s32.totalorder %s2549_s10, %s2549_s10 }
  0x6a   : > { %p2552_p9 = pnand %p2550_p7, %p2848_p10  ;;  %p2559_p5 = por %p2558_p4, %p2557_p1 }
  0x6c   : > { %p2553_p11 = pneg %p2552_p9 }
  0x6e   : > { %p2560_p6 = pnand %p2559_p5, %p2553_p11 }
  0x70   : > { %2563 = shalt.err (!%p2560_p6)
}
  0x71   : > { %2342 = dma.hbm_to_vmem [thread:$0]  (!%p2832_p8), %s3333_s23, 256, %s569_s28, [#allocation7], %s2671_s29, %s2671_s29, %s2672_s18  }
  0x72   : > { %s2921_s16 = sadd.s32 1, %s2666_s21   ;;  %s313_s12 = sadd.s32 1, %s2662_s20 }
  0x73   : > { %3334 = sst [smem:[#allocation18_spill]] %s2921_s16  ;;  %s310_s25 = ssub.s32 %s2666_s21, %s2921_s16 }
  0x74   : > { %p311_p5 = scmp.eq.s32.totalorder %s310_s25, 0  ;;  %p320_p6 = scmp.ne.s32.totalorder %s2662_s20, %s2658_s30 }
  0x75   : > { %p321_p10 = scmp.eq.s32.totalorder %s2666_s21, 0  ;;  %p2350_p12 = scmp.lt.s32.totalorder %s2666_s21, 2 }
  0x76   : > { %s2931_s13 = scalar_select %p311_p5, %s2662_s20, %s313_s12  }
  0x77   : > { %p322_p13 = por %p321_p10, %p320_p6  ;;  %s642_s14 = sand.u32 1, %s2662_s20  }
  0x78   : > { %3335 = sst [smem:[#allocation19_spill]] %s2931_s13  ;;  %s2127_s0 = sshll.u32 %s642_s14, 4 }
  0x79   : > { %s2185_s3 = sshll.u32 %s2666_s21, 8  ;;  %s3336_s11 = sld [smem:[#allocation27_spill]] }
  0x7a   : > { %s646_s28 = scalar_lea.vmem [#allocation9], %s2127_s0  ;;  %p2942_p8 = pnand %p2350_p12, %p322_p13 }
  0x7b   : > { %s653_s29 = sshll.u32 %s646_s28, 4  ;;  %s2946_s21 = scalar_lea.sflag [#allocation10], %s642_s14  ;;  %s2940_s29 = int_to_ptr.vmem [resolvable:$true] %s653_s29 }
  0x7c   : > { %p2566_p2 = pneg %p2942_p8 }
  0x7f   : > { %s2938_s24 = scalar_lea.hbm %s3336_s11, %s2185_s3  ;;  %s2569_s25 = scalar_lea.hbm %s3336_s11, 512 }
  0x80   : > { %s2564_s10 = scalar_lea.hbm %s2938_s24, 256  ;;  %p2570_p9 = scmp.lt.u32.totalorder %s2938_s24, %s3336_s11 }
  0x81   : > { %p2565_p0 = scmp.ne.s32.totalorder %s2938_s24, %s2564_s10  ;;  %p2571_p11 = scmp.lt.u32.totalorder %s2569_s25, %s2564_s10 }
  0x82   : > { %p2573_p4 = scmp.lt.u32.totalorder %s2564_s10, %s2938_s24 }
  0x83   : > { %p2567_p3 = pnand %p2566_p2, %p2565_p0  ;;  %p2572_p1 = por %p2571_p11, %p2570_p9 }
  0x85   : > { %p2568_p7 = pneg %p2567_p3  ;;  %p2574_p5 = por %p2573_p4, %p2572_p1 }
  0x87   : > { %p2575_p6 = pnand %p2574_p5, %p2568_p7 }
  0x89   : > { %2578 = shalt.err (!%p2575_p6)
}
  0x8a   : > { %s2579_s14 = scalar_lea.vmem %s2940_s29, 256  ;;  %s2673_s3 = smov [#allocation9]  }
  0x8b   : > { %p2580_p10 = scmp.ne.s32.totalorder %s2940_s29, %s2579_s14  ;;  %s2584_s27 = sshll.u32 %s2673_s3, 4  ;;  %s2585_s27 = int_to_ptr.vmem [resolvable:$false] %s2584_s27 }
  0x8c   : > { %s2586_s17 = scalar_lea.vmem %s2585_s27, 512  ;;  %p2587_p0 = scmp.lt.s32.totalorder %s2940_s29, %s2585_s27 }
  0x8d   : > { %p2582_p12 = pnand %p2580_p10, %p2566_p2  ;;  %p2588_p3 = scmp.lt.s32.totalorder %s2586_s17, %s2579_s14 }
  0x8f   : > { %p2583_p13 = pneg %p2582_p12  ;;  %p2589_p9 = por %p2588_p3, %p2587_p0 }
  0x91   : > { %p2590_p11 = pnand %p2589_p9, %p2583_p13 }
  0x93   : > { %2593 = shalt.err (!%p2590_p11)
}
  0x94   : > { %s2674_s28 = smov 64   ;;  %s2675_s10 = smov 4  }
  0x95   : > { %2346 = dma.hbm_to_vmem [thread:$0]  (!%p2942_p8), %s2938_s24, 256, %s2940_s29, %s2946_s21, %s2674_s28, %s2674_s28, %s2675_s10  }
  0x96   : > { %p3338_p2 = scmp.ne.s32.totalorder %s3327_s2, 0 }
  0x97   : > { %p3339_p7 = scmp.eq.s32.totalorder (!%p3338_p2), %s2809_s1, 0 }
  0x98   : > { %697 = sbr.rel (%p3338_p2) target bundleno = 3101 (0xc1d), region = 96 }
  0x9f   : > { %2637 = dma.done.wait (%p3339_p7), [#allocation4], 256   ;;  %p3340_p1 = pmov %p3339_p7 }
  0xa1   : > { %2639 = vsyncadd (%p3340_p1), [#allocation4], 4294967040  ;;  %p3341_p4 = pmov %p3340_p1 }
  0xa2   : > { %p3342_p5 = pmov %p3340_p1 }
  0xa3   : > { %2641 = dma.done.wait (%p3341_p4), [#allocation7], 512  }
  0xa4   : > { %2643 = vsyncadd (%p3342_p5), [#allocation7], 4294966784  ;;  %s711_s19 = sand.u32 1, %s2658_s30   ;;  %p3343_p8 = scmp.ne.s32.totalorder %s3326_s22, 0 }
  0xa5   : > { %s2985_s18 = sshll.u32 %s711_s19, 4  ;;  %s712_s2 = scalar_lea.sflag [#allocation10], %s711_s19 }
  0xa6   : > { %2645 = dma.done.wait (%p3343_p8), %s712_s2, 256  }
  0xa7   : > { %2647 = vsyncadd (%p3343_p8), %s712_s2, 4294967040  ;;  %p812_p6 = scmp.lt.s32.totalorder %s2809_s1, 1  ;;  %s3344_s14 = sld [smem:[#allocation23_spill]] }
  0xa8   : > { %s3345_s5 = sld [smem:[#allocation24_spill]]  ;;  %s3346_s7 = sld [smem:[#allocation25_spill]] }
  0xa9   : > { %s2994_s29 = scalar_select %p812_p6, %s2809_s1, 1 }
  0xaa   : > { %s3348_s19 = sld [smem:[#allocation28_spill]]  ;;  %s3350_s22 = sld [smem:[#allocation29_spill]] }
  0xab   : > { %s2186_s21 = sshll.u32 %s2994_s29, 4  ;;  %s2189_s20 = sshll.u32 %s2994_s29, 5 }
  0xac   : > { %s3352_s17 = sld [smem:[#allocation32_spill]]  ;;  %p3353_p10 = scmp.ne.s32.totalorder %s2809_s1, 0 }
  0xad   : > { %s816_s3 = scalar_lea.vmem %s3344_s14, %s2186_s21  ;;  %s3351_s14 = sld [smem:[#allocation31_spill]]  ;;  %v864_v0 = vld [vmem:[#allocation3] sm:$0xff] (!%p3353_p10)  ;;  %vm866_vm0 = vcmask (!%p3353_p10), 261120   ;;  %v865_v1 = vld [vmem:[#allocation3 + $0x8] sm:$0xff] (!%p3353_p10) }
  0xae   : > { %s3007_s28 = scalar_lea.vmem %s3345_s5, %s2186_s21  ;;  %s3016_s15 = scalar_lea.vmem %s3346_s7, %s2186_s21  ;;  %867 = vst.msk [vmem:[#allocation2] sm:$0xff] (!%p3353_p10), %vm866_vm0, %v864_v0  ;;  %868 = vst.msk [vmem:[#allocation2 + $0x8] sm:$0xff] (!%p3353_p10), %vm866_vm0, %v865_v1 }
  0xaf   : > { %s3349_s21 = sld [smem:[#allocation30_spill]]  ;;  %863 = sbr.rel (%p3353_p10) target bundleno = 182 (0xb6), region = 116 }
  0xb0   : > { %s844_s2 = scalar_lea.vmem %s3348_s19, %s2994_s29  ;;  %s3042_s25 = scalar_lea.vmem %s3350_s22, %s2189_s20 }
  0xb2   : > { %s858_s23 = scalar_lea.vmem %s3352_s17, %s2994_s29 }
  0xb3   : > { %s855_s16 = scalar_lea.vmem %s3351_s14, %s2994_s29 }
  0xb5   : > { %s852_s7 = scalar_lea.vmem %s3349_s21, %s2994_s29 }
  0xb6 PF: > { %v2424_v2 = vld [vmem:[%s816_s3] sm:$0xff]   ;;  %v2676_v3 = vmov 0.0   ;;  %v2425_v4 = vld [vmem:[%s816_s3 + $0x8] sm:$0xff]   ;;  %vm2677_vm1 = vmmov 0   ;;  %vm899_vm2 = vcmask 261120   ;;  %s3354_s13 = scalar_lea.vmem %s3278_s4, %s2994_s29  ;;  %s2678_s3 = smov 96  }
  0xb7   : > { %2223 = vmatprep.subr.bf16.mxu1 %v2676_v3  ;;  %2239 = vmatprep.subr.bf16.mxu0 %v2676_v3  ;;  %v3058_v5 = vld [vmem:[#allocation2] sm:$0xff]  ;;  %v3060_v6 = vld [vmem:[#allocation2 + $0x8] sm:$0xff]  ;;  %s2679_s14 = smov 120   ;;  %s2680_s10 = smov 88   ;;  %vm1022_vm3 = vcmask 64512   ;;  %v1014_v37 = vld [vmem:[#allocation8] sm:$0xff] }
  0xb8   : > { %2224 = vmatpush3.bf16.msra.mxu1 %v2424_v2  ;;  %2227 = vmatprep.mubr.msk.bf16.mxu1 %vm2677_vm1, %v2676_v3  ;;  %v871_v7 = vld [vmem:[#allocation6] sm:$0xff]  ;;  %v872_v8 = vld [vmem:[#allocation6 + $0x8] sm:$0xff]  ;;  %s2681_s19 = smov 80   ;;  %s2682_s11 = smov 112   ;;  %v944_v25 = vpack.c.bf16 %v3060_v6, %v3058_v5  ;;  %v1015_v39 = vld [vmem:[#allocation8 + $0x8] sm:$0xff]  ;;  %vm1070_vm4 = vcmask 130048  }
  0xb9   : > { %2225 = vmatprep.subr.bf16.mxu1 %v2676_v3  ;;  %v873_v9 = vadd.f32 %v871_v7, %v3058_v5  ;;  %2241 = vmatprep.mubr.msk.bf16.mxu0 %vm2677_vm1, %v2676_v3  ;;  %v874_v10 = vadd.f32 %v872_v8, %v3060_v6  ;;  %v2144_v12 = vld [vmem:[%s3354_s13] ss:$0 sm:$0xff]  ;;  %s2683_s24 = smov 72   ;;  %s2684_s21 = smov 104   ;;  %v2427_v24 = vld [vmem:[%s3007_s28 + $0x8] sm:$0xff]   ;;  %vm1531_vm5 = vcmask 195584  }
  0xba   : > { %v2426_v23 = vld [vmem:[%s3007_s28] sm:$0xff]   ;;  %s3355_s22 = scalar_lea.vmem %s3280_s6, %s2994_s29  ;;  %s2685_s12 = smov 8   ;;  %vm1759_vm6 = vcmask 523264  }
  0xbb   : > { %v875_v11 = vpack.c.bf16 %v874_v10, %v873_v9  ;;  %v2148_v10 = vld [vmem:[%s3355_s22] ss:$0 sm:$0xff]  ;;  %s2686_s0 = smov 16   ;;  %s2687_s27 = smov 24  }
  0xbc   : > { %2226 = vmatpush3.bf16.msra.mxu1 %v2425_v4  ;;  %s3356_s17 = scalar_lea.vmem %s3282_s8, %s2994_s29  ;;  %s3357_s30 = scalar_lea.vmem [#allocation9], %s2985_s18 }
  0xbd   : > { %2231 = vmatprep.subr.bf16.mxu1 %v2676_v3  ;;  %s3358_s20 = smov %s3357_s30  ;;  %p2178_p12 = scmp.ne.s32.totalorder %s2809_s1, 1 }
  0xbf   : > { %2228 = vmatmul.mubr.msk.bf16.vlgmr.msra.gmra.mrb[0].mxu1 %vm899_vm2, %v875_v11 }
  0xc0   : > { %2235 = vmatprep.mubr.msk.bf16.mxu1 %vm2677_vm1, %v2676_v3  ;;  %2232 = vmatpush3.bf16.msra.mxu1 %v2426_v23 }
  0xc1   : > { %2233 = vmatprep.subr.bf16.mxu1 %v2676_v3 }
  0xc4   : > { %2234 = vmatpush3.bf16.msra.mxu1 %v2427_v24 }
  0xc5   : > { %2245 = vmatprep.subr.bf16.mxu1 %v2676_v3 }
  0xc7   : > { %2236 = vmatmul.mubr.msk.bf16.vlgmr.msra.gmra.mrb[4].mxu1 %vm899_vm2, %v944_v25 }
  0xc8   : > { %2247 = vmatprep.mubr.msk.bf16.mxu1 %vm2677_vm1, %v2676_v3 }
 0x192   : > { %v937_v13 = vpop.f32.mrb[0].mxu1 }
 0x193   : > { %v938_v14 = vadd.f32 %v2144_v12, %v937_v13  ;;  %v2229_v15 = vpop.f32.mrb[1].mxu1 }
 0x194   : > { %v940_v16 = vpop.f32.mrb[2].mxu1 }
 0x195   : > { %v941_v17 = vadd.f32 %v2144_v12, %v940_v16  ;;  %v2230_v18 = vpop.f32.mrb[3].mxu1  ;;  %v1012_v19 = vmul.f32 0.35355338, %v938_v14 }
 0x197   : > { %v1013_v20 = vmul.f32 0.35355338, %v941_v17  ;;  %v1017_v21 = vpack.c.bf16 %v941_v17, %v938_v14 }
 0x199   : > { %v1016_v22 = vpack.c.bf16 %v1013_v20, %v1012_v19  ;;  %1020 = vrot.lane.b32.xlu0 %v1017_v21, %s2678_s3  ;;  %s3359_s3 = scalar_lea.vmem %s3283_s9, %s2994_s29 }
 0x19a   : > { %v1005_v11 = vpop.f32.mrb[4].mxu1 }
 0x19b   : > { %1139 = vrot.lane.b32.xlu1 %v1016_v22, %s2679_s14  ;;  %v1006_v12 = vadd.f32 %v2148_v10, %v1005_v11  ;;  %v2237_v13 = vpop.f32.mrb[5].mxu1 }
 0x19c   : > { %v1008_v14 = vpop.f32.mrb[6].mxu1 }
 0x19d   : > { %1141 = vrot.lane.b32.xlu0 %v1017_v21, %s2680_s10  ;;  %v1009_v15 = vadd.f32 %v2148_v10, %v1008_v14  ;;  %v2238_v16 = vpop.f32.mrb[7].mxu1 }
 0x19f   : > { %1263 = vrot.lane.b32.xlu1 %v1017_v21, %s2681_s19  ;;  %v1018_v17 = vpack.c.bf16 %v1009_v15, %v1006_v12  ;;  %s3360_s19 = sld [smem:[#allocation26_spill]] }
 0x1a1   : > { %1261 = vrot.lane.b32.xlu0 %v1016_v22, %s2682_s11  ;;  %2246 = vmatpush3.bf16.msra.mxu1 %v1018_v17 }
 0x1a2   : > { %2257 = vmatprep.subr.bf16.mxu1 %v2676_v3 }
 0x1a3   : > { %1384 = vrot.lane.b32.xlu1 %v1017_v21, %s2683_s24 }
 0x1a5   : > { %1382 = vrot.lane.b32.xlu0 %v1016_v22, %s2684_s21 }
 0x20b   : > { %v1021_v26 = vpop.permute.xlu0 %1020 }
 0x20c   : > { %v1027_v27 = vsel %vm1022_vm3, %v1021_v26, 0 }
 0x20d   : > { %2240 = vmatpush3.bf16.xpose.msra.mxu0 %v1027_v27  ;;  %v1140_v29 = vpop.permute.xlu1 %1139 }
 0x20e   : > { %2251 = vmatprep.subr.bf16.mxu0 %v2676_v3 }
 0x20f   : > { %v1142_v28 = vpop.permute.xlu0 %1141 }
 0x210   : > { %v1147_v30 = vsel %vm1022_vm3, %v1142_v28, 0 }
 0x211   : > { %v1264_v31 = vpop.permute.xlu1 %1263 }
 0x212   : > { %v1269_v32 = vsel %vm1022_vm3, %v1264_v31, 0 }
 0x213   : > { %v1262_v34 = vpop.permute.xlu0 %1261 }
 0x214   : > { %2242 = vmatmul.mubr.msk.bf16.vlgmr.msra.gmra.mrb[0].mxu0 %vm1022_vm3, %v1016_v22 }
 0x215   : > { %2252 = vmatpush3.bf16.xpose.msra.mxu0 %v1147_v30  ;;  %2253 = vmatprep.mubr.msk.bf16.mxu0 %vm2677_vm1, %v2676_v3  ;;  %v1385_v33 = vpop.permute.xlu1 %1384 }
 0x216   : > { %2263 = vmatprep.subr.bf16.mxu0 %v2676_v3  ;;  %v1390_v35 = vsel %vm1022_vm3, %v1385_v33, 0 }
 0x217   : > { %v1383_v36 = vpop.permute.xlu0 %1382 }
 0x21c   : > { %2254 = vmatmul.mubr.msk.bf16.vlgmr.msra.gmra.mrb[4].mxu0 %vm1022_vm3, %v1140_v29 }
 0x21d   : > { %2264 = vmatpush3.bf16.xpose.msra.mxu0 %v1269_v32  ;;  %2265 = vmatprep.mubr.msk.bf16.mxu0 %vm2677_vm1, %v2676_v3 }
 0x21e   : > { %2275 = vmatprep.subr.bf16.mxu0 %v2676_v3 }
 0x224   : > { %2266 = vmatmul.mubr.msk.bf16.vlgmr.msra.gmra.mrb[8].mxu0 %vm1022_vm3, %v1262_v34 }
 0x225   : > { %2276 = vmatpush3.bf16.xpose.msra.mxu0 %v1390_v35  ;;  %2277 = vmatprep.mubr.msk.bf16.mxu0 %vm2677_vm1, %v2676_v3 }
 0x226   : > { %2287 = vmatprep.subr.bf16.mxu0 %v2676_v3 }
 0x22c   : > { %2278 = vmatmul.mubr.msk.bf16.vlgmr.msra.gmra.mrb[12].mxu0 %vm1022_vm3, %v1383_v36 }
 0x22d   : > { %2291 = vmatprep.mubr.msk.bf16.mxu0 %vm2677_vm1, %v2676_v3 }
 0x2e7   : > { %v1063_v38 = vpop.f32.mrb[0].mxu0 }
 0x2e8   : > { %v1064_v40 = vadd.f32 %v1063_v38, %v1014_v37  ;;  %v2243_v41 = vpop.f32.mrb[1].mxu0 }
 0x2e9   : > { %v1066_v42 = vpop.f32.mrb[2].mxu0 }
 0x2ea   : > { %v1067_v43 = vadd.f32 %v1066_v42, %v1015_v39  ;;  %v2244_v44 = vpop.f32.mrb[3].mxu0  ;;  %v1071_v45 = vsel %vm1070_vm4, %v1064_v40, -inf }
 0x2eb   : > { %1072 = vmax.xlane.f32.xlu1 %v1071_v45 }
 0x2ec   : > { %v1074_v46 = vsel %vm1070_vm4, %v1067_v43, -inf }
 0x2ed   : > { %1075 = vmax.xlane.f32.xlu0 %v1074_v46 }
 0x2ef   : > { %v1183_v47 = vpop.f32.mrb[4].mxu0 }
 0x2f0   : > { %v1184_v48 = vadd.f32 %v1183_v47, %v1014_v37  ;;  %v2255_v49 = vpop.f32.mrb[5].mxu0 }
 0x2f1   : > { %v1186_v50 = vpop.f32.mrb[6].mxu0 }
 0x2f2   : > { %v1187_v51 = vadd.f32 %v1186_v50, %v1015_v39  ;;  %v2256_v52 = vpop.f32.mrb[7].mxu0  ;;  %v1190_v53 = vsel %vm1070_vm4, %v1184_v48, -inf }
 0x2f3   : > { %1191 = vmax.xlane.f32.xlu0 %v1190_v53 }
 0x2f4   : > { %v1193_v54 = vsel %vm1070_vm4, %v1187_v51, -inf }
 0x2f5   : > { %1194 = vmax.xlane.f32.xlu1 %v1193_v54 }
 0x2f7   : > { %v1305_v55 = vpop.f32.mrb[8].mxu0 }
 0x2f8   : > { %v1306_v56 = vadd.f32 %v1305_v55, %v1014_v37  ;;  %v2267_v57 = vpop.f32.mrb[9].mxu0 }
 0x2f9   : > { %v1308_v58 = vpop.f32.mrb[10].mxu0 }
 0x2fa   : > { %v1309_v59 = vadd.f32 %v1308_v58, %v1015_v39  ;;  %v2268_v60 = vpop.f32.mrb[11].mxu0  ;;  %v1312_v61 = vsel %vm1070_vm4, %v1306_v56, -inf }
 0x2fb   : > { %1313 = vmax.xlane.f32.xlu0 %v1312_v61 }
 0x2fc   : > { %v1315_v62 = vsel %vm1070_vm4, %v1309_v59, -inf }
 0x2fd   : > { %1316 = vmax.xlane.f32.xlu1 %v1315_v62 }
 0x2ff   : > { %v1426_v63 = vpop.f32.mrb[12].mxu0 }
 0x300   : > { %v1427_v0 = vadd.f32 %v1426_v63, %v1014_v37  ;;  %v2279_v1 = vpop.f32.mrb[13].mxu0 }
 0x301   : > { %v1429_v2 = vpop.f32.mrb[14].mxu0 }
 0x302   : > { %v3114_v4 = vadd.f32 %v1429_v2, %v1015_v39  ;;  %v2280_v7 = vpop.f32.mrb[15].mxu0  ;;  %v1433_v8 = vsel %vm1070_vm4, %v1427_v0, -inf }
 0x303   : > { %1434 = vmax.xlane.f32.xlu0 %v1433_v8 }
 0x304   : > { %v1436_v9 = vsel %vm1070_vm4, %v3114_v4, -inf }
 0x305   : > { %1437 = vmax.xlane.f32.xlu1 %v1436_v9 }
 0x378   : > { %v1073_v18 = vpop.xlane.xlu1 %1072 }
 0x379   : > { %v1077_v19 = vsub.f32 %v1064_v40, %v1073_v18 }
 0x37a   : > { %v1076_v20 = vpop.xlane.xlu0 %1075 }
 0x37b   : > { %v1079_v21 = vmul.f32 1.442695, %v1077_v19  ;;  %v1078_v22 = vsub.f32 %v1067_v43, %v1076_v20 }
 0x37d   : > { %2436 = vpow2.f32 %v1079_v21  ;;  %v1081_v23 = vmul.f32 1.442695, %v1078_v22 }
 0x37f   : > { %2438 = vpow2.f32 %v1081_v23 }
 0x380   : > { %v1192_v24 = vpop.xlane.xlu0 %1191 }
 0x381   : > { %v1196_v25 = vsub.f32 %v1184_v48, %v1192_v24 }
 0x382   : > { %v1195_v26 = vpop.xlane.xlu1 %1194 }
 0x383   : > { %v1198_v27 = vmul.f32 1.442695, %v1196_v25  ;;  %v1197_v28 = vsub.f32 %v1187_v51, %v1195_v26 }
 0x385   : > { %2440 = vpow2.f32 %v1198_v27  ;;  %v1200_v29 = vmul.f32 1.442695, %v1197_v28 }
 0x387   : > { %v2437_v30 = vpop.eup %2436  ;;  %2442 = vpow2.f32 %v1200_v29 }
 0x388   : > { %v1314_v31 = vpop.xlane.xlu0 %1313  ;;  %v1083_v32 = vsel %vm1070_vm4, %v2437_v30, 0.0 }
 0x389   : > { %v2439_v33 = vpop.eup %2438  ;;  %v1318_v34 = vsub.f32 %v1306_v56, %v1314_v31  ;;  %1084 = vadd.xlane.f32.xlu0 %v1083_v32 }
 0x38a   : > { %v1317_v35 = vpop.xlane.xlu1 %1316  ;;  %v1086_v36 = vsel %vm1070_vm4, %v2439_v33, 0.0 }
 0x38b   : > { %v1320_v37 = vmul.f32 1.442695, %v1318_v34  ;;  %v1319_v38 = vsub.f32 %v1309_v59, %v1317_v35  ;;  %1087 = vadd.xlane.f32.xlu1 %v1086_v36  ;;  %v2428_v35 = vld [vmem:[%s3016_s15] sm:$0xff]  }
 0x38c   : > { %2288 = vmatpush3.bf16.msra.mxu0 %v2428_v35 }
 0x38d   : > { %2444 = vpow2.f32 %v1320_v37  ;;  %v1322_v39 = vmul.f32 1.442695, %v1319_v38  ;;  %2289 = vmatprep.subr.bf16.mxu0 %v2676_v3 }
 0x38f   : > { %v2441_v40 = vpop.eup %2440  ;;  %2446 = vpow2.f32 %v1322_v39 }
 0x390   : > { %v1435_v41 = vpop.xlane.xlu0 %1434  ;;  %v1202_v42 = vsel %vm1070_vm4, %v2441_v40, 0.0 }
 0x391   : > { %v2443_v43 = vpop.eup %2442  ;;  %v1439_v44 = vsub.f32 %v1427_v0, %v1435_v41  ;;  %1203 = vadd.xlane.f32.xlu0 %v1202_v42 }
 0x392   : > { %v1205_v45 = vsel %vm1070_vm4, %v2443_v43, 0.0  ;;  %v1438_v53 = vpop.xlane.xlu1 %1437 }
 0x393   : > { %v1441_v46 = vmul.f32 1.442695, %v1439_v44  ;;  %1206 = vadd.xlane.f32.xlu1 %v1205_v45  ;;  %v1440_v54 = vsub.f32 %v3114_v4, %v1438_v53 }
 0x395   : > { %2448 = vpow2.f32 %v1441_v46  ;;  %v1443_v55 = vmul.f32 1.442695, %v1440_v54 }
 0x397   : > { %v2445_v47 = vpop.eup %2444  ;;  %2450 = vpow2.f32 %v1443_v55 }
 0x398   : > { %v1324_v48 = vsel %vm1070_vm4, %v2445_v47, 0.0 }
 0x399   : > { %v2447_v49 = vpop.eup %2446  ;;  %1325 = vadd.xlane.f32.xlu0 %v1324_v48 }
 0x39a   : > { %v1327_v50 = vsel %vm1070_vm4, %v2447_v49, 0.0 }
 0x39b   : > { %1328 = vadd.xlane.f32.xlu1 %v1327_v50 }
 0x39f   : > { %v2449_v51 = vpop.eup %2448 }
 0x3a0   : > { %v1445_v52 = vsel %vm1070_vm4, %v2449_v51, 0.0 }
 0x3a1   : > { %1446 = vadd.xlane.f32.xlu0 %v1445_v52  ;;  %v2451_v56 = vpop.eup %2450 }
 0x3a2   : > { %v1448_v57 = vsel %vm1070_vm4, %v2451_v56, 0.0 }
 0x3ac   : > { %1335 = vrot.lane.b32.xlu1 %v1018_v17, %s2682_s11  ;;  %s3361_s11 = scalar_lea.vmem %s3360_s19, %s2994_s29  ;;  %s3366_s29 = sld [smem:[#allocation33_spill]] (!%p2178_p12) }
 0x3b7   : > { %1214 = vrot.lane.b32.xlu0 %v1018_v17, %s2679_s14 }
 0x3d0   : > { %1449 = vadd.xlane.f32.xlu1 %v1448_v57 }
 0x3e1   : > { %1456 = vrot.lane.b32.xlu1 %v1018_v17, %s2684_s21 }
 0x416   : > { %v1085_v58 = vpop.xlane.xlu0 %1084 }
 0x417   : > { %2452 = vrcp.f32 %v1085_v58 }
 0x418   : > { %v1088_v59 = vpop.xlane.xlu1 %1087 }
 0x419   : > { %2454 = vrcp.f32 %v1088_v59 }
 0x41e   : > { %v1204_v62 = vpop.xlane.xlu0 %1203 }
 0x420   : > { %v1207_v60 = vpop.xlane.xlu1 %1206 }
 0x421   : > { %v2453_v61 = vpop.eup %2452  ;;  %2456 = vrcp.f32 %v1207_v60 }
 0x422   : > { %v1091_v0 = vmul.f32 %v2453_v61, %v2437_v30  ;;  %2458 = vrcp.f32 %v1204_v62 }
 0x423   : > { %v2455_v63 = vpop.eup %2454 }
 0x424   : > { %v1092_v1 = vmul.f32 %v2455_v63, %v2439_v33 }
 0x426   : > { %v1093_v2 = vpack.c.bf16 %v1092_v1, %v1091_v0  ;;  %v1326_v7 = vpop.xlane.xlu0 %1325  ;;  %v2160_v1 = vld [vmem:[%s3356_s17] ss:$0 sm:$0xff] }
 0x428   : > { %v1329_v4 = vpop.xlane.xlu1 %1328  ;;  %2248 = vmatmul.mubr.msk.bf16.vlgmr.msra.gmra.mrb[8].mxu1 %vm1070_vm4, %v1093_v2 }
 0x429   : > { %2259 = vmatprep.mubr.msk.bf16.mxu1 %vm2677_vm1, %v2676_v3  ;;  %2460 = vrcp.f32 %v1329_v4 }
 0x42a   : > { %2462 = vrcp.f32 %v1326_v7 }
 0x42b   : > { %v2457_v8 = vpop.eup %2456 }
 0x42c   : > { %v2459_v10 = vpop.eup %2458  ;;  %v1211_v11 = vmul.f32 %v2457_v8, %v2443_v43  ;;  %v1336_v16 = vpop.permute.xlu1 %1335  ;;  %v2429_v43 = vld [vmem:[%s3016_s15 + $0x8] sm:$0xff]  }
 0x42d   : > { %v1210_v12 = vmul.f32 %v2459_v10, %v2441_v40  ;;  %2290 = vmatpush3.bf16.msra.mxu0 %v2429_v43 }
 0x42e   : > { %v1447_v9 = vpop.xlane.xlu0 %1446  ;;  %2303 = vmatprep.subr.bf16.mxu0 %v2676_v3 }
 0x42f   : > { %v1212_v14 = vpack.c.bf16 %v1211_v11, %v1210_v12  ;;  %2464 = vrcp.f32 %v1447_v9 }
 0x432   : > { %v1215_v13 = vpop.permute.xlu0 %1214 }
 0x433   : > { %2258 = vmatpush3.bf16.msra.mxu1 %v1215_v13  ;;  %v2461_v15 = vpop.eup %2460 }
 0x434   : > { %2269 = vmatprep.subr.bf16.mxu1 %v2676_v3  ;;  %v2463_v17 = vpop.eup %2462  ;;  %v1333_v18 = vmul.f32 %v2461_v15, %v2447_v49 }
 0x435   : > { %v1332_v19 = vmul.f32 %v2463_v17, %v2445_v47 }
 0x436   : > { %2260 = vmatmul.mubr.msk.bf16.vlgmr.msra.gmra.mrb[12].mxu1 %vm1070_vm4, %v1212_v14 }
 0x437   : > { %2270 = vmatpush3.bf16.msra.mxu1 %v1336_v16  ;;  %2271 = vmatprep.mubr.msk.bf16.mxu1 %vm2677_vm1, %v2676_v3  ;;  %v1334_v20 = vpack.c.bf16 %v1333_v18, %v1332_v19 }
 0x438   : > { %2281 = vmatprep.subr.bf16.mxu1 %v2676_v3 }
 0x439   : > { %v2465_v23 = vpop.eup %2464 }
 0x43a   : > { %v1453_v25 = vmul.f32 %v2465_v23, %v2449_v51  ;;  %v2430_v23 = vld [vmem:[%s3357_s30] sm:$0xff]  }
 0x43e   : > { %2272 = vmatmul.mubr.msk.bf16.vlgmr.msra.gmra.mrb[16].mxu1 %vm1070_vm4, %v1334_v20 }
 0x43f   : > { %2283 = vmatprep.mubr.msk.bf16.mxu1 %vm2677_vm1, %v2676_v3 }
 0x45d   : > { %v1450_v21 = vpop.xlane.xlu1 %1449 }
 0x45e   : > { %2466 = vrcp.f32 %v1450_v21 }
 0x461   : > { %v1457_v22 = vpop.permute.xlu1 %1456 }
 0x462   : > { %2282 = vmatpush3.bf16.msra.mxu1 %v1457_v22 }
 0x463   : > { %2295 = vmatprep.subr.bf16.mxu1 %v2676_v3 }
 0x468   : > { %v2467_v24 = vpop.eup %2466 }
 0x469   : > { %v1454_v26 = vmul.f32 %v2467_v24, %v2451_v56  ;;  %v2431_v24 = vld [vmem:[%s3358_s20 + $0x8] sm:$0xff]   ;;  %s3367_s20 = sld [smem:[#allocation34_spill]] (!%p2178_p12) }
 0x46b   : > { %v1455_v27 = vpack.c.bf16 %v1454_v26, %v1453_v25  ;;  %v2432_v25 = vld [vmem:[%s3042_s25] sm:$0xff]   ;;  %v2433_v26 = vld [vmem:[%s3042_s25 + $0x8] sm:$0xff]  }
 0x46d   : > { %2284 = vmatmul.mubr.msk.bf16.vlgmr.msra.gmra.mrb[20].mxu1 %vm1070_vm4, %v1455_v27 }
 0x46e   : > { %2299 = vmatprep.mubr.msk.bf16.mxu1 %vm2677_vm1, %v2676_v3  ;;  %2296 = vmatpush3.bf16.msra.mxu1 %v2430_v23  ;;  %v2177_v23 = vld [vmem:[%s858_s23] ss:$0 sm:$0xff] }
 0x46f   : > { %2297 = vmatprep.subr.bf16.mxu1 %v2676_v3 }
 0x472   : > { %2298 = vmatpush3.bf16.msra.mxu1 %v2431_v24 }
 0x4fb   : > { %v1131_v28 = vpop.f32.mrb[8].mxu1 }
 0x4fc   : > { %v2249_v29 = vpop.f32.mrb[9].mxu1 }
 0x4fd   : > { %v1134_v30 = vpop.f32.mrb[10].mxu1 }
 0x4fe   : > { %v2250_v31 = vpop.f32.mrb[11].mxu1 }
 0x509   : > { %v1254_v32 = vpop.f32.mrb[12].mxu1 }
 0x50a   : > { %v2261_v33 = vpop.f32.mrb[13].mxu1 }
 0x50b   : > { %v1257_v34 = vpop.f32.mrb[14].mxu1 }
 0x50c   : > { %v2409_v36 = vpack.i.bf16 %v1257_v34, %v1254_v32  ;;  %v2262_v37 = vpop.f32.mrb[15].mxu1  ;;  %v2164_v34 = vld [vmem:[%s3359_s3] ss:$0 sm:$0xff] }
 0x50e   : > { %2410 = vrot.lane.b32.xlu0 %v2409_v36, %s2685_s12 }
 0x511   : > { %v1375_v38 = vpop.f32.mrb[16].mxu1 }
 0x512   : > { %v2273_v39 = vpop.f32.mrb[17].mxu1 }
 0x513   : > { %v1378_v40 = vpop.f32.mrb[18].mxu1  ;;  %v2165_v39 = vld [vmem:[%s3361_s11] ss:$0 sm:$0xff] }
 0x514   : > { %v2414_v41 = vpack.i.bf16 %v1378_v40, %v1375_v38  ;;  %v2274_v42 = vpop.f32.mrb[19].mxu1 }
 0x516   : > { %2415 = vrot.lane.b32.xlu1 %v2414_v41, %s2686_s0 }
 0x540   : > { %v1496_v44 = vpop.f32.mrb[20].mxu1 }
 0x541   : > { %v2285_v45 = vpop.f32.mrb[21].mxu1 }
 0x542   : > { %v1499_v46 = vpop.f32.mrb[22].mxu1  ;;  %v2435_v45 = vld [vmem:[%s3042_s25 + $0x18] sm:$0xff]  }
 0x543   : > { %v2419_v47 = vpack.i.bf16 %v1499_v46, %v1496_v44  ;;  %v2286_v48 = vpop.f32.mrb[23].mxu1  ;;  %v2434_v44 = vld [vmem:[%s3042_s25 + $0x10] sm:$0xff]   ;;  %v2166_v46 = vld [vmem:[%s844_s2] ss:$0 sm:$0xff] }
 0x545   : > { %2420 = vrot.lane.b32.xlu0 %v2419_v47, %s2687_s27 }
 0x580   : > { %v2411_v49 = vpop.permute.xlu0 %2410 }
 0x581   : > { %v2413_v51 = vunpack.i.h.bf16 %v2411_v49  ;;  %v2412_v52 = vunpack.i.l.bf16 %v2411_v49 }
 0x583   : > { %v1528_v56 = vsel %vm1022_vm3, %v1134_v30, %v2413_v51  ;;  %v1527_v57 = vsel %vm1022_vm3, %v1131_v28, %v2412_v52 }
 0x588   : > { %v2416_v50 = vpop.permute.xlu1 %2415 }
 0x589   : > { %v2418_v53 = vunpack.i.h.bf16 %v2416_v50  ;;  %v2417_v54 = vunpack.i.l.bf16 %v2416_v50 }
 0x58b   : > { %v1530_v60 = vsel %vm1070_vm4, %v1528_v56, %v2418_v53  ;;  %v1529_v61 = vsel %vm1070_vm4, %v1527_v57, %v2417_v54 }
 0x5b7   : > { %v2421_v55 = vpop.permute.xlu0 %2420 }
 0x5b8   : > { %v2423_v58 = vunpack.i.h.bf16 %v2421_v55  ;;  %v2422_v59 = vunpack.i.l.bf16 %v2421_v55 }
 0x5ba   : > { %v1533_v62 = vsel %vm1531_vm5, %v1530_v60, %v2423_v58  ;;  %v1532_v63 = vsel %vm1531_vm5, %v1529_v61, %v2422_v59 }
 0x5bb   : > { %v1534_v0 = vpack.c.bf16 %v1533_v62, %v1532_v63 }
 0x5bd   : > { %2292 = vmatmul.mubr.msk.bf16.vlgmr.msra.gmra.mrb[16].mxu0 %vm899_vm2, %v1534_v0 }
 0x5be   : > { %2311 = vmatprep.mubr.msk.bf16.mxu0 %vm2677_vm1, %v2676_v3  ;;  %2304 = vmatpush3.bf16.msra.mxu0 %v2432_v25 }
 0x5bf   : > { %2305 = vmatprep.subr.bf16.mxu0 %v2676_v3 }
 0x5c2   : > { %2306 = vmatpush3.bf16.msra.mxu0 %v2433_v26 }
 0x5c3   : > { %2307 = vmatprep.subr.bf16.mxu0 %v2676_v3 }
 0x5c6   : > { %2308 = vmatpush3.bf16.msra.mxu0 %v2434_v44 }
 0x5c7   : > { %2309 = vmatprep.subr.bf16.mxu0 %v2676_v3  ;;  %v2170_v3 = vld [vmem:[%s852_s7] ss:$0 sm:$0xff] }
 0x5ca   : > { %2310 = vmatpush3.bf16.msra.mxu0 %v2435_v45 }
 0x690   : > { %v1595_v2 = vpop.f32.mrb[16].mxu0 }
 0x691   : > { %v1596_v4 = vadd.f32 %v2160_v1, %v1595_v2  ;;  %v2293_v7 = vpop.f32.mrb[17].mxu0 }
 0x692   : > { %v1598_v8 = vpop.f32.mrb[18].mxu0 }
 0x693   : > { %v1599_v9 = vadd.f32 %v2160_v1, %v1598_v8  ;;  %v2294_v10 = vpop.f32.mrb[19].mxu0  ;;  %v1602_v11 = vadd.f32 %v1596_v4, %v3058_v5 }
 0x695   : > { %v1604_v12 = vsel %vm899_vm2, %v1602_v11, 0.0  ;;  %v1603_v13 = vadd.f32 %v1599_v9, %v3060_v6 }
 0x696   : > { %1605 = vadd.xlane.f32.xlu1 %v1604_v12 }
 0x697   : > { %v1607_v14 = vsel %vm899_vm2, %v1603_v13, 0.0 }
 0x698   : > { %1608 = vadd.xlane.f32.xlu0 %v1607_v14 }
 0x723   : > { %v1606_v15 = vpop.xlane.xlu1 %1605 }
 0x724   : > { %v1611_v16 = vmul.f32 0.03125, %v1606_v15 }
 0x725   : > { %v1609_v17 = vpop.xlane.xlu0 %1608 }
 0x726   : > { %v1613_v18 = vsub.f32 %v1602_v11, %v1611_v16  ;;  %v1612_v19 = vmul.f32 0.03125, %v1609_v17 }
 0x728   : > { %v1614_v20 = vsub.f32 %v1603_v13, %v1612_v19  ;;  %v1615_v21 = vmul.f32 %v1613_v18, %v1613_v18 }
 0x72a   : > { %v1617_v5 = vsel %vm899_vm2, %v1615_v21, 0.0  ;;  %v1616_v22 = vmul.f32 %v1614_v20, %v1614_v20 }
 0x72b   : > { %1618 = vadd.xlane.f32.xlu0 %v1617_v5  ;;  %v2176_v5 = vld [vmem:[%s855_s16] ss:$0 sm:$0xff] }
 0x72c   : > { %v1620_v6 = vsel %vm899_vm2, %v1616_v22, 0.0 }
 0x72d   : > { %1621 = vadd.xlane.f32.xlu1 %v1620_v6 }
 0x7b8   : > { %v1619_v27 = vpop.xlane.xlu0 %1618 }
 0x7b9   : > { %v1623_v28 = vmul.f32 0.03125, %v1619_v27 }
 0x7ba   : > { %v1622_v29 = vpop.xlane.xlu1 %1621 }
 0x7bb   : > { %v1625_v30 = vadd.f32 1e-05, %v1623_v28  ;;  %v1624_v31 = vmul.f32 0.03125, %v1622_v29 }
 0x7bd   : > { %2468 = vrsqrt.f32 %v1625_v30  ;;  %v1626_v32 = vadd.f32 1e-05, %v1624_v31 }
 0x7bf   : > { %2470 = vrsqrt.f32 %v1626_v32 }
 0x7c7   : > { %v2469_v33 = vpop.eup %2468 }
 0x7c8   : > { %v1629_v35 = vmul.f32 %v2469_v33, %v1613_v18 }
 0x7c9   : > { %v2471_v36 = vpop.eup %2470 }
 0x7ca   : > { %v1638_v37 = vmul.f32 %v2164_v34, %v1629_v35  ;;  %v1630_v38 = vmul.f32 %v2471_v36, %v1614_v20 }
 0x7cc   : > { %v1639_v40 = vmul.f32 %v2164_v34, %v1630_v38  ;;  %v1647_v41 = vadd.f32 %v2165_v39, %v1638_v37 }
 0x7ce   : > { %v1648_v42 = vadd.f32 %v2165_v39, %v1639_v40 }
 0x7d0   : > { %v1649_v43 = vpack.c.bf16 %v1648_v42, %v1647_v41 }
 0x7d2   : > { %2300 = vmatmul.mubr.msk.bf16.vlgmr.msra.gmra.mrb[24].mxu1 %vm899_vm2, %v1649_v43 }
 0x8a5   : > { %v1710_v47 = vpop.f32.mrb[24].mxu1 }
 0x8a6   : > { %v1711_v48 = vadd.f32 %v2166_v46, %v1710_v47  ;;  %v2301_v49 = vpop.f32.mrb[25].mxu1 }
 0x8a7   : > { %v1713_v50 = vpop.f32.mrb[26].mxu1 }
 0x8a8   : > { %v1714_v51 = vadd.f32 %v2166_v46, %v1713_v50  ;;  %v2302_v52 = vpop.f32.mrb[27].mxu1  ;;  %v1717_v53 = vmax.f32 %v1711_v48, 0.0  ;;  %v2179_v48 = vld [vmem:[%s3366_s29] ss:$0 sm:$0xff] (!%p2178_p12) }
 0x8a9   : > { %v2180_v50 = vld [vmem:[%s3367_s20] ss:$0 sm:$0xff] (!%p2178_p12) }
 0x8aa   : > { %v1718_v54 = vmax.f32 %v1714_v51, 0.0 }
 0x8ac   : > { %v1719_v55 = vpack.c.bf16 %v1718_v54, %v1717_v53 }
 0x8ae   : > { %2312 = vmatmul.mubr.msk.bf16.vlgmr.msra.gmra.mrb[20].mxu0 %vm1759_vm6, %v1719_v55 }
 0x981   : > { %v1797_v56 = vpop.f32.mrb[20].mxu0 }
 0x982   : > { %v1798_v57 = vadd.f32 %v2170_v3, %v1797_v56  ;;  %v2313_v58 = vpop.f32.mrb[21].mxu0 }
 0x983   : > { %v1800_v59 = vpop.f32.mrb[22].mxu0 }
 0x984   : > { %v1801_v60 = vadd.f32 %v2170_v3, %v1800_v59  ;;  %v2314_v61 = vpop.f32.mrb[23].mxu0  ;;  %v1804_v62 = vadd.f32 %v1798_v57, %v1647_v41 }
 0x986   : > { %v1806_v63 = vsel %vm899_vm2, %v1804_v62, 0.0  ;;  %v1805_v0 = vadd.f32 %v1801_v60, %v1648_v42 }
 0x987   : > { %1807 = vadd.xlane.f32.xlu0 %v1806_v63 }
 0x988   : > { %v1809_v1 = vsel %vm899_vm2, %v1805_v0, 0.0 }
 0x989   : > { %1810 = vadd.xlane.f32.xlu1 %v1809_v1 }
 0xa14   : > { %v1808_v2 = vpop.xlane.xlu0 %1807 }
 0xa15   : > { %v1812_v4 = vmul.f32 0.03125, %v1808_v2 }
 0xa16   : > { %v1811_v7 = vpop.xlane.xlu1 %1810 }
 0xa17   : > { %v1814_v8 = vsub.f32 %v1804_v62, %v1812_v4  ;;  %v1813_v9 = vmul.f32 0.03125, %v1811_v7 }
 0xa19   : > { %v1815_v10 = vsub.f32 %v1805_v0, %v1813_v9  ;;  %v1816_v11 = vmul.f32 %v1814_v8, %v1814_v8 }
 0xa1b   : > { %v1818_v12 = vsel %vm899_vm2, %v1816_v11, 0.0  ;;  %v1817_v13 = vmul.f32 %v1815_v10, %v1815_v10 }
 0xa1c   : > { %1819 = vadd.xlane.f32.xlu0 %v1818_v12 }
 0xa1d   : > { %v1821_v14 = vsel %vm899_vm2, %v1817_v13, 0.0 }
 0xa1e   : > { %1822 = vadd.xlane.f32.xlu1 %v1821_v14 }
 0xaa9   : > { %v1820_v15 = vpop.xlane.xlu0 %1819 }
 0xaaa   : > { %v1824_v16 = vmul.f32 0.03125, %v1820_v15 }
 0xaab   : > { %v1823_v17 = vpop.xlane.xlu1 %1822 }
 0xaac   : > { %v1826_v18 = vadd.f32 1e-05, %v1824_v16  ;;  %v1825_v19 = vmul.f32 0.03125, %v1823_v17 }
 0xaae   : > { %2472 = vrsqrt.f32 %v1826_v18  ;;  %v1827_v20 = vadd.f32 1e-05, %v1825_v19 }
 0xab0   : > { %2474 = vrsqrt.f32 %v1827_v20 }
 0xab8   : > { %v2473_v21 = vpop.eup %2472 }
 0xab9   : > { %v1830_v22 = vmul.f32 %v2473_v21, %v1814_v8 }
 0xaba   : > { %v2475_v6 = vpop.eup %2474 }
 0xabb   : > { %v1839_v24 = vmul.f32 %v2176_v5, %v1830_v22  ;;  %v1831_v25 = vmul.f32 %v2475_v6, %v1815_v10  ;;  %1855 = sbr.rel (%p2178_p12) target bundleno = 3069 (0xbfd), region = 120 }
 0xabd   : > { %v1848_v26 = vadd.f32 %v2177_v23, %v1839_v24  ;;  %v1840_v27 = vmul.f32 %v2176_v5, %v1831_v25 }
 0xabf   : > { %1850 = vst.msk [vmem:[#allocation2] sm:$0xff] %vm899_vm2, %v1848_v26  ;;  %v1849_v28 = vadd.f32 %v2177_v23, %v1840_v27  ;;  %v1856_v29 = vsel (!%p2178_p12), %vm899_vm2, %v1848_v26, 0.0 }
 0xac0   : > { %1857 = vadd.xlane.f32.xlu0 (!%p2178_p12), %v1856_v29 }
 0xac1   : > { %1851 = vst.msk [vmem:[#allocation2 + $0x8] sm:$0xff] %vm899_vm2, %v1849_v28  ;;  %v1859_v30 = vsel (!%p2178_p12), %vm899_vm2, %v1849_v28, 0.0 }
 0xac4   : > { %1860 = vadd.xlane.f32.xlu0 %v1859_v30 }
 0xb4d   : > { %v1858_v31 = vpop.xlane.xlu0 %1857 }
 0xb4e   : > { %v1862_v32 = vmul.f32 0.03125, %v1858_v31 }
 0xb50   : > { %v1864_v33 = vsub.f32 %v1848_v26, %v1862_v32 }
 0xb51   : > { %v1861_v34 = vpop.xlane.xlu0 %1860 }
 0xb52   : > { %v1863_v35 = vmul.f32 0.03125, %v1861_v34  ;;  %v1866_v36 = vmul.f32 %v1864_v33, %v1864_v33 }
 0xb54   : > { %v1865_v37 = vsub.f32 %v1849_v28, %v1863_v35  ;;  %v1868_v38 = vsel %vm899_vm2, %v1866_v36, 0.0 }
 0xb55   : > { %1869 = vadd.xlane.f32.xlu1 %v1868_v38 }
 0xb56   : > { %v1867_v39 = vmul.f32 %v1865_v37, %v1865_v37 }
 0xb58   : > { %v1871_v40 = vsel %vm899_vm2, %v1867_v39, 0.0 }
 0xb59   : > { %1872 = vadd.xlane.f32.xlu1 %v1871_v40 }
 0xbe2   : > { %v1870_v41 = vpop.xlane.xlu1 %1869 }
 0xbe3   : > { %v1874_v42 = vmul.f32 0.03125, %v1870_v41 }
 0xbe5   : > { %v1876_v43 = vadd.f32 1e-05, %v1874_v42 }
 0xbe6   : > { %v1873_v44 = vpop.xlane.xlu1 %1872 }
 0xbe7   : > { %2476 = vrsqrt.f32 %v1876_v43  ;;  %v1875_v45 = vmul.f32 0.03125, %v1873_v44 }
 0xbe9   : > { %v1877_v46 = vadd.f32 1e-05, %v1875_v45 }
 0xbeb   : > { %2478 = vrsqrt.f32 %v1877_v46 }
 0xbf1   : > { %v2477_v47 = vpop.eup %2476 }
 0xbf2   : > { %v1880_v49 = vmul.f32 %v2477_v47, %v1864_v33 }
 0xbf4   : > { %v1889_v51 = vmul.f32 %v2179_v48, %v1880_v49 }
 0xbf5   : > { %v2479_v52 = vpop.eup %2478 }
 0xbf6   : > { %v1898_v53 = vadd.f32 %v2180_v50, %v1889_v51  ;;  %v1881_v54 = vmul.f32 %v2479_v52, %v1865_v37 }
 0xbf8   : > { %1900 = vst.msk [vmem:[#allocation11] sm:$0xff] %vm899_vm2, %v1898_v53  ;;  %v1890_v55 = vmul.f32 %v2179_v48, %v1881_v54 }
 0xbfa   : > { %v1899_v3 = vadd.f32 %v2180_v50, %v1890_v55 }
 0xbfc   : > { %1901 = vst.msk [vmem:[#allocation11 + $0x8] sm:$0xff] %vm899_vm2, %v1899_v3 }
 0xbfd PF: > { %p2354_p13 = scmp.eq.s32.totalorder %s2809_s1, 1  ;;  %s2688_s18 = smov [#allocation11]  }
 0xbfe   : > { %s1908_s13 = sshll.u32 %s2688_s18, 4  ;;  %s1909_s13 = int_to_ptr.vmem [resolvable:$true] %s1908_s13 }
 0xbff   : > { %s2594_s3 = scalar_lea.vmem %s1909_s13, 256  ;;  %p2601_p11 = scmp.lt.s32.totalorder %s1909_s13, %s1909_s13 }
 0xc00   : > { %p2595_p0 = scmp.ne.s32.totalorder %s1909_s13, %s2594_s3  ;;  %p2602_p2 = scmp.lt.s32.totalorder %s2594_s3, %s2594_s3 }
 0xc02   : > { %p2596_p3 = pnand %p2595_p0, %p2354_p13  ;;  %p2603_p7 = por %p2602_p2, %p2601_p11 }
 0xc04   : > { %p2597_p9 = pneg %p2596_p3 }
 0xc06   : > { %p2604_p1 = pnand %p2603_p7, %p2597_p9 }
 0xc08   : > { %2607 = shalt.err (!%p2604_p1)
}
 0xc09   : > { %s3368_s19 = sld [smem:[#allocation35_spill]] }
 0xc0f   : > { %s2608_s11 = scalar_lea.hbm %s3368_s19, 256 }
 0xc10   : > { %p2609_p4 = scmp.ne.s32.totalorder %s3368_s19, %s2608_s11  ;;  %p2614_p6 = scmp.lt.u32.totalorder %s2608_s11, %s3368_s19 }
 0xc12   : > { %p2610_p5 = pnand %p2609_p4, %p2354_p13 }
 0xc14   : > { %p2611_p8 = pneg %p2610_p5 }
 0xc16   : > { %p2616_p10 = pnand %p2614_p6, %p2611_p8 }
 0xc18   : > { %2619 = shalt.err (!%p2616_p10)
}
 0xc19   : > { %s2689_s22 = smov 128  }
 0xc1a   : > { %2330 = dma.vmem_to_hbm [thread:$0]  (%p2354_p13), %s1909_s13, 256, %s3368_s19, [#allocation5], %s2689_s22, %s2689_s22, %s2685_s12  }
 0xc1b   : > { %2649 = dma.done.wait (%p2354_p13), [#allocation5], 256  }
 0xc1c   : > { %2651 = vsyncadd (%p2354_p13), [#allocation5], 4294967040 }
 0xc1d PF: > { %s3369_s21 = sld [smem:[#allocation18_spill]]  ;;  %s3370_s0 = sld [smem:[#allocation16_spill]] }
 0xc1e   : > { %s3371_s30 = sld [smem:[#allocation17_spill]]  ;;  %s3372_s20 = sld [smem:[#allocation19_spill]] }
 0xc23   : > { %p32_p12 = scmp.ge.s32.totalorder %s3369_s21, 4  }
 0xc25   :  { %34 = sbr.rel (!%p32_p12) target bundleno = 23 (0x17), region = 193 }
 0xc2c   :  { %1924 = vsyncpa [#allocation4], 1 }
 0xc2d   :  { %1926 = vsyncpa [#allocation4 + $0x1], 1 }
 0xc2e   :  { %1927 = vsyncpa [#allocation7], 1 }
 0xc2f   :  { %1928 = vsyncpa [#allocation10], 1 }
 0xc30   :  { %1930 = vsyncpa [#allocation10 + $0x1], 1 }
 0xc31   :  { %1931 = vsyncpa [#allocation5], 1 }
 0xc32   :  { %1933 = vsyncpa [#allocation5 + $0x1], 1 }

</bundles_post_ra>
